<compile_context>
chip_gen: v5e
topology: v5e:2x2
jax: 0.10.0
libtpu: 0.0.40
codegen_flags: <defaults>
</compile_context>

<pallas_src>
import jax
import jax.numpy as jnp
from jax.experimental import pallas as pl
from jax.experimental.pallas import tpu as pltpu


def _round_up(x, m):
    return (x + m - 1) // m * m


def _make_uarf_kernel(th, W, cin, cmid, classes):
    nrows = th + 2          # th output rows need th+2 padded input rows (3x3 halo)
    kw = 3 * cin            # contraction depth of one kx tap (9 for RGB)

    def kernel(*args):
        row_refs = args[:nrows]                                   # th+2 x (1,1,cin,W+2) bf16
        w1_ref, ba_ref, wcls_ref, out_ref, xall_ref = args[nrows:nrows + 5]

        # Stage the halo'd channel-planar strip (padded rows r0 .. r0+th+1) in VMEM.
        for j in range(nrows):
            xall_ref[cin * j:cin * (j + 1), :] = row_refs[j][0, 0]

        w1 = w1_ref[...]        # (cmid, 3*kw) bf16, BN scale folded; col = dx*kw + dy*cin + c
        wcls = wcls_ref[...]    # (classes, cmid) bf16
        bias = ba_ref[:, 0:1]   # (cmid, 1) f32  (folded inference-BN bias)
        alpha = ba_ref[:, 1:2]  # (cmid, 1) f32  (PReLU slope)

        for r in range(th):
            # level1 3x3 conv: three MXU matmuls (one per kx tap) on contiguous (kw, W)
            # slices of the staged strip; f32 accumulation.  W sits on lanes.
            acc = jnp.dot(w1[:, 0:kw],
                          xall_ref[cin * r:cin * r + kw, 0:W],
                          preferred_element_type=jnp.float32)
            for dx in (1, 2):
                acc = acc + jnp.dot(
                    w1[:, dx * kw:(dx + 1) * kw],
                    xall_ref[cin * r:cin * r + kw, dx:dx + W],
                    preferred_element_type=jnp.float32)

            # folded BatchNorm bias + per-channel PReLU (channels on sublanes, f32 VPU)
            y = acc + bias
            y = jnp.where(y > 0, y, alpha * y)

            # TODO(synk): DDFC2 = ResDDFConvGuidedFilter(nin1=32) — its class definition is
            # not provided in the reference source, so it is treated as an identity pass.

            # classifier 1x1 conv: (classes, cmid) @ (cmid, W); exact-width NCHW row store.
            out_ref[0, :, r, :] = jnp.dot(wcls, y.astype(jnp.bfloat16),
                                          preferred_element_type=jnp.float32)

    return kernel


def u_adaptive_receptive_field(x_nchw, w1_oihw, bn_gamma, bn_beta, bn_mean, bn_var,
                               prelu_alpha, wcls_oihw, *, eps=1e-3, row_tile=8):
    B, Cin, H, W = x_nchw.shape
    Cmid = w1_oihw.shape[0]
    classes = wcls_oihw.shape[0]

    th = max(8, _round_up(min(row_tile, _round_up(H, 8)), 8))    # rows per grid step
    Hpad = _round_up(H, th)
    n_steps = Hpad // th
    nrows = th + 2

    # --- glue: channel-planar, spatially padded input (~1x input size; no im2col in HBM) ---
    xpad = jnp.pad(x_nchw, ((0, 0), (0, 0), (1, 1 + Hpad - H), (1, 1)))
    xp = jnp.transpose(xpad, (0, 2, 1, 3)).astype(jnp.bfloat16)   # (B, Hpad+2, Cin, W+2)

    # --- glue: fold inference-mode BN scale into the 3x3 weight (f32), then cast to bf16 ---
    scale = bn_gamma / jnp.sqrt(bn_var + eps)
    bias = bn_beta - bn_mean * scale
    # w1m[o, dx*3*Cin + dy*Cin + c] = w1[o, c, dy, dx] * scale[o]
    w1m = (jnp.transpose(w1_oihw, (0, 3, 2, 1)).reshape(Cmid, 9 * Cin)
           * scale[:, None]).astype(jnp.bfloat16)
    ba = jnp.stack([bias, prelu_alpha], axis=1).astype(jnp.float32)     # (Cmid, 2)
    wclsm = wcls_oihw[:, :, 0, 0].astype(jnp.bfloat16)                  # (classes, Cmid)

    # th+2 overlapping single-row views of the SAME padded input array (block size 1 along
    # the padded-row axis -> element-indexed block, so the halo overlap is legal).
    row_specs = [
        pl.BlockSpec((1, 1, Cin, W + 2), lambda b, i, j=j: (b, i * th + j, 0, 0))
        for j in range(nrows)
    ]

    cost = pl.CostEstimate(
        flops=2 * B * Hpad * W * (9 * Cin * Cmid + Cmid * classes),
        transcendentals=0,
        bytes_accessed=(xp.size * 2 + B * classes * Hpad * W * 4
                        + (w1m.size + wclsm.size) * 2 + ba.size * 4))

    out = pl.pallas_call(
        _make_uarf_kernel(th, W, Cin, Cmid, classes),
        out_shape=jax.ShapeDtypeStruct((B, classes, Hpad, W), jnp.float32),
        grid_spec=pltpu.PrefetchScalarGridSpec(
            num_scalar_prefetch=0,
            grid=(B, n_steps),
            in_specs=row_specs + [
                pl.BlockSpec((Cmid, 9 * Cin), lambda b, i: (0, 0)),   # folded 3x3 weight
                pl.BlockSpec((Cmid, 2), lambda b, i: (0, 0)),         # [bias | prelu alpha]
                pl.BlockSpec((classes, Cmid), lambda b, i: (0, 0)),   # classifier weight
            ],
            out_specs=pl.BlockSpec((1, classes, th, W), lambda b, i: (b, 0, i, 0)),
            scratch_shapes=[pltpu.VMEM((Cin * nrows, W + 2), jnp.bfloat16)],
        ),
        compiler_params=pltpu.CompilerParams(
            dimension_semantics=("parallel", "parallel"),
            vmem_limit_bytes=32 * 1024 * 1024),
        cost_estimate=cost,
    )(*([xp] * nrows), w1m, ba, wclsm)

    # NCHW comes straight out of the kernel; only trim padded rows if H % th != 0.
    return out[:, :, :H, :] if Hpad != H else out


def _reference(x, w1, gamma, beta, mean, var, alpha, wcls, eps=1e-3):
    o1 = jax.lax.conv_general_dilated(
        x, w1, (1, 1), ((1, 1), (1, 1)),
        dimension_numbers=("NCHW", "OIHW", "NCHW"))
    o1 = gamma.reshape(1, -1, 1, 1) * (o1 - mean.reshape(1, -1, 1, 1)) \
        / jnp.sqrt(var.reshape(1, -1, 1, 1) + eps) + beta.reshape(1, -1, 1, 1)
    o1 = jnp.where(o1 > 0, o1, alpha.reshape(1, -1, 1, 1) * o1)
    return jax.lax.conv_general_dilated(
        o1, wcls, (1, 1), ((0, 0), (0, 0)),
        dimension_numbers=("NCHW", "OIHW", "NCHW"))


if __name__ == "__main__":
    key = jax.random.PRNGKey(0)
    ks = jax.random.split(key, 8)

    B, Cin, H, W = 2, 3, 16, 16
    Cmid, classes = 32, 20

    # deterministic synthetic parameters (module __init__ shapes; no checkpoint)
    x = jax.random.normal(ks[0], (B, Cin, H, W), jnp.float32)
    w1 = 0.1 * jax.random.normal(ks[1], (Cmid, Cin, 3, 3), jnp.float32)       # Conv2d(3,32,3)
    gamma = 1.0 + 0.1 * jax.random.normal(ks[2], (Cmid,), jnp.float32)        # BN weight
    beta = 0.1 * jax.random.normal(ks[3], (Cmid,), jnp.float32)               # BN bias
    mean = 0.1 * jax.random.normal(ks[4], (Cmid,), jnp.float32)               # BN running_mean
    var = jnp.abs(1.0 + 0.1 * jax.random.normal(ks[5], (Cmid,), jnp.float32)) # BN running_var
    alpha = jnp.full((Cmid,), 0.25, jnp.float32)                              # PReLU default
    wcls = 0.1 * jax.random.normal(ks[6], (classes, Cmid, 1, 1), jnp.float32) # Conv2d(32,20,1)

    # row_tile=8 -> grid (B, H/8) = (2, 2): exercises the halo'd multi-step path and keeps
    # an even grid for v7x's two TensorCores.
    out = u_adaptive_receptive_field(x, w1, gamma, beta, mean, var, alpha, wcls,
                                     row_tile=8)
    out = jax.block_until_ready(out)

    ref = _reference(x, w1, gamma, beta, mean, var, alpha, wcls)
    assert out.shape == (B, classes, H, W), out.shape
    # tolerance covers bf16 MXU-operand rounding (accumulation stays f32)
    assert jnp.allclose(out, ref, atol=3e-2, rtol=3e-2), \
        float(jnp.max(jnp.abs(out - ref)))

    print("KERNEL_OK")
</pallas_src>

<mosaic_0001>
module attributes {stable_mosaic.version = 11 : i64} {
  func.func @kernel(%arg0: i32, %arg1: i32, %arg2: memref<1x1x3x18xbf16, #tpu.memory_space<vmem>>, %arg3: memref<1x1x3x18xbf16, #tpu.memory_space<vmem>>, %arg4: memref<1x1x3x18xbf16, #tpu.memory_space<vmem>>, %arg5: memref<1x1x3x18xbf16, #tpu.memory_space<vmem>>, %arg6: memref<1x1x3x18xbf16, #tpu.memory_space<vmem>>, %arg7: memref<1x1x3x18xbf16, #tpu.memory_space<vmem>>, %arg8: memref<1x1x3x18xbf16, #tpu.memory_space<vmem>>, %arg9: memref<1x1x3x18xbf16, #tpu.memory_space<vmem>>, %arg10: memref<1x1x3x18xbf16, #tpu.memory_space<vmem>>, %arg11: memref<1x1x3x18xbf16, #tpu.memory_space<vmem>>, %arg12: memref<32x27xbf16, #tpu.memory_space<vmem>>, %arg13: memref<32x2xf32, #tpu.memory_space<vmem>>, %arg14: memref<20x32xbf16, #tpu.memory_space<vmem>>, %arg15: memref<1x20x8x16xf32, #tpu.memory_space<vmem>>, %arg16: memref<30x18xbf16, #tpu.memory_space<vmem>>) attributes {dimension_semantics = [#tpu.dimension_semantics<parallel>, #tpu.dimension_semantics<parallel>], iteration_bounds = array<i64: 2, 2>, scalar_prefetch = 0 : i64, scratch_operands = 1 : i64, tpu.core_type = #tpu.core_type<tc>, window_params = [{transform_indices = @transform_0, window_bounds = array<i64: 1, 1, 3, 18>}, {transform_indices = @transform_1, window_bounds = array<i64: 1, 1, 3, 18>}, {transform_indices = @transform_2, window_bounds = array<i64: 1, 1, 3, 18>}, {transform_indices = @transform_3, window_bounds = array<i64: 1, 1, 3, 18>}, {transform_indices = @transform_4, window_bounds = array<i64: 1, 1, 3, 18>}, {transform_indices = @transform_5, window_bounds = array<i64: 1, 1, 3, 18>}, {transform_indices = @transform_6, window_bounds = array<i64: 1, 1, 3, 18>}, {transform_indices = @transform_7, window_bounds = array<i64: 1, 1, 3, 18>}, {transform_indices = @transform_8, window_bounds = array<i64: 1, 1, 3, 18>}, {transform_indices = @transform_9, window_bounds = array<i64: 1, 1, 3, 18>}, {pipeline_mode = #tpu.pipeline_mode<synchronous>, transform_indices = @transform_10, window_bounds = array<i64: 32, 27>}, {pipeline_mode = #tpu.pipeline_mode<synchronous>, transform_indices = @transform_11, window_bounds = array<i64: 32, 2>}, {pipeline_mode = #tpu.pipeline_mode<synchronous>, transform_indices = @transform_12, window_bounds = array<i64: 20, 32>}, {transform_indices = @transform_13, window_bounds = array<i64: 1, 20, 8, 16>}]} {
    %c0 = arith.constant 0 : index
    %c0_0 = arith.constant 0 : index
    %c0_1 = arith.constant 0 : index
    %c0_2 = arith.constant 0 : index
    %0 = vector.load %arg2[%c0, %c0_0, %c0_1, %c0_2] : memref<1x1x3x18xbf16, #tpu.memory_space<vmem>>, vector<1x1x3x18xbf16>
    %1 = vector.shape_cast %0 : vector<1x1x3x18xbf16> to vector<3x18xbf16>
    %c0_3 = arith.constant 0 : index
    %c0_4 = arith.constant 0 : index
    %2 = vector.load %arg16[%c0_3, %c0_4] : memref<30x18xbf16, #tpu.memory_space<vmem>>, vector<3x18xbf16>
    tpu.vector_store %arg16[%c0_3, %c0_4], %1 {strides = array<i32>} : memref<30x18xbf16, #tpu.memory_space<vmem>>, vector<3x18xbf16>,
    %c0_5 = arith.constant 0 : index
    %c0_6 = arith.constant 0 : index
    %c0_7 = arith.constant 0 : index
    %c0_8 = arith.constant 0 : index
    %3 = vector.load %arg3[%c0_5, %c0_6, %c0_7, %c0_8] : memref<1x1x3x18xbf16, #tpu.memory_space<vmem>>, vector<1x1x3x18xbf16>
    %4 = vector.shape_cast %3 : vector<1x1x3x18xbf16> to vector<3x18xbf16>
    %c3 = arith.constant 3 : index
    %c0_9 = arith.constant 0 : index
    %5 = vector.load %arg16[%c3, %c0_9] : memref<30x18xbf16, #tpu.memory_space<vmem>>, vector<3x18xbf16>
    tpu.vector_store %arg16[%c3, %c0_9], %4 {strides = array<i32>} : memref<30x18xbf16, #tpu.memory_space<vmem>>, vector<3x18xbf16>,
    %c0_10 = arith.constant 0 : index
    %c0_11 = arith.constant 0 : index
    %c0_12 = arith.constant 0 : index
    %c0_13 = arith.constant 0 : index
    %6 = vector.load %arg4[%c0_10, %c0_11, %c0_12, %c0_13] : memref<1x1x3x18xbf16, #tpu.memory_space<vmem>>, vector<1x1x3x18xbf16>
    %7 = vector.shape_cast %6 : vector<1x1x3x18xbf16> to vector<3x18xbf16>
    %c6 = arith.constant 6 : index
    %c0_14 = arith.constant 0 : index
    %8 = vector.load %arg16[%c6, %c0_14] : memref<30x18xbf16, #tpu.memory_space<vmem>>, vector<3x18xbf16>
    tpu.vector_store %arg16[%c6, %c0_14], %7 {strides = array<i32>} : memref<30x18xbf16, #tpu.memory_space<vmem>>, vector<3x18xbf16>,
    %c0_15 = arith.constant 0 : index
    %c0_16 = arith.constant 0 : index
    %c0_17 = arith.constant 0 : index
    %c0_18 = arith.constant 0 : index
    %9 = vector.load %arg5[%c0_15, %c0_16, %c0_17, %c0_18] : memref<1x1x3x18xbf16, #tpu.memory_space<vmem>>, vector<1x1x3x18xbf16>
    %10 = vector.shape_cast %9 : vector<1x1x3x18xbf16> to vector<3x18xbf16>
    %c9 = arith.constant 9 : index
    %c0_19 = arith.constant 0 : index
    %11 = vector.load %arg16[%c9, %c0_19] : memref<30x18xbf16, #tpu.memory_space<vmem>>, vector<3x18xbf16>
    tpu.vector_store %arg16[%c9, %c0_19], %10 {strides = array<i32>} : memref<30x18xbf16, #tpu.memory_space<vmem>>, vector<3x18xbf16>,
    %c0_20 = arith.constant 0 : index
    %c0_21 = arith.constant 0 : index
    %c0_22 = arith.constant 0 : index
    %c0_23 = arith.constant 0 : index
    %12 = vector.load %arg6[%c0_20, %c0_21, %c0_22, %c0_23] : memref<1x1x3x18xbf16, #tpu.memory_space<vmem>>, vector<1x1x3x18xbf16>
    %13 = vector.shape_cast %12 : vector<1x1x3x18xbf16> to vector<3x18xbf16>
    %c12 = arith.constant 12 : index
    %c0_24 = arith.constant 0 : index
    %14 = vector.load %arg16[%c12, %c0_24] : memref<30x18xbf16, #tpu.memory_space<vmem>>, vector<3x18xbf16>
    tpu.vector_store %arg16[%c12, %c0_24], %13 {strides = array<i32>} : memref<30x18xbf16, #tpu.memory_space<vmem>>, vector<3x18xbf16>,
    %c0_25 = arith.constant 0 : index
    %c0_26 = arith.constant 0 : index
    %c0_27 = arith.constant 0 : index
    %c0_28 = arith.constant 0 : index
    %15 = vector.load %arg7[%c0_25, %c0_26, %c0_27, %c0_28] : memref<1x1x3x18xbf16, #tpu.memory_space<vmem>>, vector<1x1x3x18xbf16>
    %16 = vector.shape_cast %15 : vector<1x1x3x18xbf16> to vector<3x18xbf16>
    %c15 = arith.constant 15 : index
    %c0_29 = arith.constant 0 : index
    %17 = vector.load %arg16[%c15, %c0_29] : memref<30x18xbf16, #tpu.memory_space<vmem>>, vector<3x18xbf16>
    tpu.vector_store %arg16[%c15, %c0_29], %16 {strides = array<i32>} : memref<30x18xbf16, #tpu.memory_space<vmem>>, vector<3x18xbf16>,
    %c0_30 = arith.constant 0 : index
    %c0_31 = arith.constant 0 : index
    %c0_32 = arith.constant 0 : index
    %c0_33 = arith.constant 0 : index
    %18 = vector.load %arg8[%c0_30, %c0_31, %c0_32, %c0_33] : memref<1x1x3x18xbf16, #tpu.memory_space<vmem>>, vector<1x1x3x18xbf16>
    %19 = vector.shape_cast %18 : vector<1x1x3x18xbf16> to vector<3x18xbf16>
    %c18 = arith.constant 18 : index
    %c0_34 = arith.constant 0 : index
    %20 = vector.load %arg16[%c18, %c0_34] : memref<30x18xbf16, #tpu.memory_space<vmem>>, vector<3x18xbf16>
    tpu.vector_store %arg16[%c18, %c0_34], %19 {strides = array<i32>} : memref<30x18xbf16, #tpu.memory_space<vmem>>, vector<3x18xbf16>,
    %c0_35 = arith.constant 0 : index
    %c0_36 = arith.constant 0 : index
    %c0_37 = arith.constant 0 : index
    %c0_38 = arith.constant 0 : index
    %21 = vector.load %arg9[%c0_35, %c0_36, %c0_37, %c0_38] : memref<1x1x3x18xbf16, #tpu.memory_space<vmem>>, vector<1x1x3x18xbf16>
    %22 = vector.shape_cast %21 : vector<1x1x3x18xbf16> to vector<3x18xbf16>
    %c21 = arith.constant 21 : index
    %c0_39 = arith.constant 0 : index
    %23 = vector.load %arg16[%c21, %c0_39] : memref<30x18xbf16, #tpu.memory_space<vmem>>, vector<3x18xbf16>
    tpu.vector_store %arg16[%c21, %c0_39], %22 {strides = array<i32>} : memref<30x18xbf16, #tpu.memory_space<vmem>>, vector<3x18xbf16>,
    %c0_40 = arith.constant 0 : index
    %c0_41 = arith.constant 0 : index
    %c0_42 = arith.constant 0 : index
    %c0_43 = arith.constant 0 : index
    %24 = vector.load %arg10[%c0_40, %c0_41, %c0_42, %c0_43] : memref<1x1x3x18xbf16, #tpu.memory_space<vmem>>, vector<1x1x3x18xbf16>
    %25 = vector.shape_cast %24 : vector<1x1x3x18xbf16> to vector<3x18xbf16>
    %c24 = arith.constant 24 : index
    %c0_44 = arith.constant 0 : index
    %26 = vector.load %arg16[%c24, %c0_44] : memref<30x18xbf16, #tpu.memory_space<vmem>>, vector<3x18xbf16>
    tpu.vector_store %arg16[%c24, %c0_44], %25 {strides = array<i32>} : memref<30x18xbf16, #tpu.memory_space<vmem>>, vector<3x18xbf16>,
    %c0_45 = arith.constant 0 : index
    %c0_46 = arith.constant 0 : index
    %c0_47 = arith.constant 0 : index
    %c0_48 = arith.constant 0 : index
    %27 = vector.load %arg11[%c0_45, %c0_46, %c0_47, %c0_48] : memref<1x1x3x18xbf16, #tpu.memory_space<vmem>>, vector<1x1x3x18xbf16>
    %28 = vector.shape_cast %27 : vector<1x1x3x18xbf16> to vector<3x18xbf16>
    %c27 = arith.constant 27 : index
    %c0_49 = arith.constant 0 : index
    %29 = vector.load %arg16[%c27, %c0_49] : memref<30x18xbf16, #tpu.memory_space<vmem>>, vector<3x18xbf16>
    tpu.vector_store %arg16[%c27, %c0_49], %28 {strides = array<i32>} : memref<30x18xbf16, #tpu.memory_space<vmem>>, vector<3x18xbf16>,
    %c0_50 = arith.constant 0 : index
    %c0_51 = arith.constant 0 : index
    %30 = vector.load %arg12[%c0_50, %c0_51] : memref<32x27xbf16, #tpu.memory_space<vmem>>, vector<32x27xbf16>
    %c0_52 = arith.constant 0 : index
    %c0_53 = arith.constant 0 : index
    %31 = vector.load %arg14[%c0_52, %c0_53] : memref<20x32xbf16, #tpu.memory_space<vmem>>, vector<20x32xbf16>
    %c0_54 = arith.constant 0 : index
    %c0_55 = arith.constant 0 : index
    %32 = vector.load %arg13[%c0_54, %c0_55] : memref<32x2xf32, #tpu.memory_space<vmem>>, vector<32x1xf32>
    %c0_56 = arith.constant 0 : index
    %c1 = arith.constant 1 : index
    %33 = vector.load %arg13[%c0_56, %c1] : memref<32x2xf32, #tpu.memory_space<vmem>>, vector<32x1xf32>
    %34 = vector.extract_strided_slice %30 {offsets = [0, 0], sizes = [32, 9], strides = [1, 1]} : vector<32x27xbf16> to vector<32x9xbf16>
    %c0_57 = arith.constant 0 : index
    %c0_58 = arith.constant 0 : index
    %35 = vector.load %arg16[%c0_57, %c0_58] : memref<30x18xbf16, #tpu.memory_space<vmem>>, vector<9x16xbf16>
    %cst = arith.constant dense<0.000000e+00> : vector<32x16xf32>
    %36 = tpu.matmul %34, %35, %cst {dimension_numbers = #tpu.dot_dimension_numbers<[1], [0], [0], [1], [0, 0, 1, 1], [], []>} : vector<32x9xbf16>, vector<9x16xbf16>, vector<32x16xf32> -> vector<32x16xf32>
    %37 = vector.extract_strided_slice %30 {offsets = [0, 9], sizes = [32, 9], strides = [1, 1]} : vector<32x27xbf16> to vector<32x9xbf16>
    %c0_59 = arith.constant 0 : index
    %c1_60 = arith.constant 1 : index
    %38 = vector.load %arg16[%c0_59, %c1_60] : memref<30x18xbf16, #tpu.memory_space<vmem>>, vector<9x16xbf16>
    %cst_61 = arith.constant dense<0.000000e+00> : vector<32x16xf32>
    %39 = tpu.matmul %37, %38, %cst_61 {dimension_numbers = #tpu.dot_dimension_numbers<[1], [0], [0], [1], [0, 0, 1, 1], [], []>} : vector<32x9xbf16>, vector<9x16xbf16>, vector<32x16xf32> -> vector<32x16xf32>
    %40 = arith.addf %36, %39 : vector<32x16xf32>
    %41 = vector.extract_strided_slice %30 {offsets = [0, 18], sizes = [32, 9], strides = [1, 1]} : vector<32x27xbf16> to vector<32x9xbf16>
    %c0_62 = arith.constant 0 : index
    %c2 = arith.constant 2 : index
    %42 = vector.load %arg16[%c0_62, %c2] : memref<30x18xbf16, #tpu.memory_space<vmem>>, vector<9x16xbf16>
    %cst_63 = arith.constant dense<0.000000e+00> : vector<32x16xf32>
    %43 = tpu.matmul %41, %42, %cst_63 {dimension_numbers = #tpu.dot_dimension_numbers<[1], [0], [0], [1], [0, 0, 1, 1], [], []>} : vector<32x9xbf16>, vector<9x16xbf16>, vector<32x16xf32> -> vector<32x16xf32>
    %44 = arith.addf %40, %43 : vector<32x16xf32>
    %45 = vector.broadcast %32 : vector<32x1xf32> to vector<32x16xf32>
    %46 = arith.addf %44, %45 : vector<32x16xf32>
    %cst_64 = arith.constant 0.000000e+00 : f32
    %47 = vector.broadcast %cst_64 : f32 to vector<32x16xf32>
    %48 = arith.cmpf ogt, %46, %47 : vector<32x16xf32>
    %49 = vector.broadcast %33 : vector<32x1xf32> to vector<32x16xf32>
    %50 = arith.mulf %49, %46 : vector<32x16xf32>
    %51 = arith.select %48, %46, %50 : vector<32x16xi1>, vector<32x16xf32>
    %52 = arith.truncf %51 : vector<32x16xf32> to vector<32x16xbf16>
    %cst_65 = arith.constant dense<0.000000e+00> : vector<20x16xf32>
    %53 = tpu.matmul %31, %52, %cst_65 {dimension_numbers = #tpu.dot_dimension_numbers<[1], [0], [0], [1], [0, 0, 1, 1], [], []>} : vector<20x32xbf16>, vector<32x16xbf16>, vector<20x16xf32> -> vector<20x16xf32>
    %c0_66 = arith.constant 0 : index
    %c0_67 = arith.constant 0 : index
    %c0_68 = arith.constant 0 : index
    %c0_69 = arith.constant 0 : index
    %54 = vector.load %arg15[%c0_66, %c0_67, %c0_68, %c0_69] : memref<1x20x8x16xf32, #tpu.memory_space<vmem>>, vector<1x20x1x16xf32>
    %55 = vector.shape_cast %54 : vector<1x20x1x16xf32> to vector<20x16xf32>
    %56 = vector.shape_cast %53 : vector<20x16xf32> to vector<1x20x1x16xf32>
    tpu.vector_store %arg15[%c0_66, %c0_67, %c0_68, %c0_69], %56 {strides = array<i32>} : memref<1x20x8x16xf32, #tpu.memory_space<vmem>>, vector<1x20x1x16xf32>,
    %57 = vector.extract_strided_slice %30 {offsets = [0, 0], sizes = [32, 9], strides = [1, 1]} : vector<32x27xbf16> to vector<32x9xbf16>
    %c3_70 = arith.constant 3 : index
    %c0_71 = arith.constant 0 : index
    %58 = vector.load %arg16[%c3_70, %c0_71] : memref<30x18xbf16, #tpu.memory_space<vmem>>, vector<9x16xbf16>
    %cst_72 = arith.constant dense<0.000000e+00> : vector<32x16xf32>
    %59 = tpu.matmul %57, %58, %cst_72 {dimension_numbers = #tpu.dot_dimension_numbers<[1], [0], [0], [1], [0, 0, 1, 1], [], []>} : vector<32x9xbf16>, vector<9x16xbf16>, vector<32x16xf32> -> vector<32x16xf32>
    %60 = vector.extract_strided_slice %30 {offsets = [0, 9], sizes = [32, 9], strides = [1, 1]} : vector<32x27xbf16> to vector<32x9xbf16>
    %c3_73 = arith.constant 3 : index
    %c1_74 = arith.constant 1 : index
    %61 = vector.load %arg16[%c3_73, %c1_74] : memref<30x18xbf16, #tpu.memory_space<vmem>>, vector<9x16xbf16>
    %cst_75 = arith.constant dense<0.000000e+00> : vector<32x16xf32>
    %62 = tpu.matmul %60, %61, %cst_75 {dimension_numbers = #tpu.dot_dimension_numbers<[1], [0], [0], [1], [0, 0, 1, 1], [], []>} : vector<32x9xbf16>, vector<9x16xbf16>, vector<32x16xf32> -> vector<32x16xf32>
    %63 = arith.addf %59, %62 : vector<32x16xf32>
    %64 = vector.extract_strided_slice %30 {offsets = [0, 18], sizes = [32, 9], strides = [1, 1]} : vector<32x27xbf16> to vector<32x9xbf16>
    %c3_76 = arith.constant 3 : index
    %c2_77 = arith.constant 2 : index
    %65 = vector.load %arg16[%c3_76, %c2_77] : memref<30x18xbf16, #tpu.memory_space<vmem>>, vector<9x16xbf16>
    %cst_78 = arith.constant dense<0.000000e+00> : vector<32x16xf32>
    %66 = tpu.matmul %64, %65, %cst_78 {dimension_numbers = #tpu.dot_dimension_numbers<[1], [0], [0], [1], [0, 0, 1, 1], [], []>} : vector<32x9xbf16>, vector<9x16xbf16>, vector<32x16xf32> -> vector<32x16xf32>
    %67 = arith.addf %63, %66 : vector<32x16xf32>
    %68 = vector.broadcast %32 : vector<32x1xf32> to vector<32x16xf32>
    %69 = arith.addf %67, %68 : vector<32x16xf32>
    %cst_79 = arith.constant 0.000000e+00 : f32
    %70 = vector.broadcast %cst_79 : f32 to vector<32x16xf32>
    %71 = arith.cmpf ogt, %69, %70 : vector<32x16xf32>
    %72 = vector.broadcast %33 : vector<32x1xf32> to vector<32x16xf32>
    %73 = arith.mulf %72, %69 : vector<32x16xf32>
    %74 = arith.select %71, %69, %73 : vector<32x16xi1>, vector<32x16xf32>
    %75 = arith.truncf %74 : vector<32x16xf32> to vector<32x16xbf16>
    %cst_80 = arith.constant dense<0.000000e+00> : vector<20x16xf32>
    %76 = tpu.matmul %31, %75, %cst_80 {dimension_numbers = #tpu.dot_dimension_numbers<[1], [0], [0], [1], [0, 0, 1, 1], [], []>} : vector<20x32xbf16>, vector<32x16xbf16>, vector<20x16xf32> -> vector<20x16xf32>
    %c0_81 = arith.constant 0 : index
    %c0_82 = arith.constant 0 : index
    %c1_83 = arith.constant 1 : index
    %c0_84 = arith.constant 0 : index
    %77 = vector.load %arg15[%c0_81, %c0_82, %c1_83, %c0_84] : memref<1x20x8x16xf32, #tpu.memory_space<vmem>>, vector<1x20x1x16xf32>
    %78 = vector.shape_cast %77 : vector<1x20x1x16xf32> to vector<20x16xf32>
    %79 = vector.shape_cast %76 : vector<20x16xf32> to vector<1x20x1x16xf32>
    tpu.vector_store %arg15[%c0_81, %c0_82, %c1_83, %c0_84], %79 {strides = array<i32>} : memref<1x20x8x16xf32, #tpu.memory_space<vmem>>, vector<1x20x1x16xf32>,
    %80 = vector.extract_strided_slice %30 {offsets = [0, 0], sizes = [32, 9], strides = [1, 1]} : vector<32x27xbf16> to vector<32x9xbf16>
    %c6_85 = arith.constant 6 : index
    %c0_86 = arith.constant 0 : index
    %81 = vector.load %arg16[%c6_85, %c0_86] : memref<30x18xbf16, #tpu.memory_space<vmem>>, vector<9x16xbf16>
    %cst_87 = arith.constant dense<0.000000e+00> : vector<32x16xf32>
    %82 = tpu.matmul %80, %81, %cst_87 {dimension_numbers = #tpu.dot_dimension_numbers<[1], [0], [0], [1], [0, 0, 1, 1], [], []>} : vector<32x9xbf16>, vector<9x16xbf16>, vector<32x16xf32> -> vector<32x16xf32>
    %83 = vector.extract_strided_slice %30 {offsets = [0, 9], sizes = [32, 9], strides = [1, 1]} : vector<32x27xbf16> to vector<32x9xbf16>
    %c6_88 = arith.constant 6 : index
    %c1_89 = arith.constant 1 : index
    %84 = vector.load %arg16[%c6_88, %c1_89] : memref<30x18xbf16, #tpu.memory_space<vmem>>, vector<9x16xbf16>
    %cst_90 = arith.constant dense<0.000000e+00> : vector<32x16xf32>
    %85 = tpu.matmul %83, %84, %cst_90 {dimension_numbers = #tpu.dot_dimension_numbers<[1], [0], [0], [1], [0, 0, 1, 1], [], []>} : vector<32x9xbf16>, vector<9x16xbf16>, vector<32x16xf32> -> vector<32x16xf32>
    %86 = arith.addf %82, %85 : vector<32x16xf32>
    %87 = vector.extract_strided_slice %30 {offsets = [0, 18], sizes = [32, 9], strides = [1, 1]} : vector<32x27xbf16> to vector<32x9xbf16>
    %c6_91 = arith.constant 6 : index
    %c2_92 = arith.constant 2 : index
    %88 = vector.load %arg16[%c6_91, %c2_92] : memref<30x18xbf16, #tpu.memory_space<vmem>>, vector<9x16xbf16>
    %cst_93 = arith.constant dense<0.000000e+00> : vector<32x16xf32>
    %89 = tpu.matmul %87, %88, %cst_93 {dimension_numbers = #tpu.dot_dimension_numbers<[1], [0], [0], [1], [0, 0, 1, 1], [], []>} : vector<32x9xbf16>, vector<9x16xbf16>, vector<32x16xf32> -> vector<32x16xf32>
    %90 = arith.addf %86, %89 : vector<32x16xf32>
    %91 = vector.broadcast %32 : vector<32x1xf32> to vector<32x16xf32>
    %92 = arith.addf %90, %91 : vector<32x16xf32>
    %cst_94 = arith.constant 0.000000e+00 : f32
    %93 = vector.broadcast %cst_94 : f32 to vector<32x16xf32>
    %94 = arith.cmpf ogt, %92, %93 : vector<32x16xf32>
    %95 = vector.broadcast %33 : vector<32x1xf32> to vector<32x16xf32>
    %96 = arith.mulf %95, %92 : vector<32x16xf32>
    %97 = arith.select %94, %92, %96 : vector<32x16xi1>, vector<32x16xf32>
    %98 = arith.truncf %97 : vector<32x16xf32> to vector<32x16xbf16>
    %cst_95 = arith.constant dense<0.000000e+00> : vector<20x16xf32>
    %99 = tpu.matmul %31, %98, %cst_95 {dimension_numbers = #tpu.dot_dimension_numbers<[1], [0], [0], [1], [0, 0, 1, 1], [], []>} : vector<20x32xbf16>, vector<32x16xbf16>, vector<20x16xf32> -> vector<20x16xf32>
    %c0_96 = arith.constant 0 : index
    %c0_97 = arith.constant 0 : index
    %c2_98 = arith.constant 2 : index
    %c0_99 = arith.constant 0 : index
    %100 = vector.load %arg15[%c0_96, %c0_97, %c2_98, %c0_99] : memref<1x20x8x16xf32, #tpu.memory_space<vmem>>, vector<1x20x1x16xf32>
    %101 = vector.shape_cast %100 : vector<1x20x1x16xf32> to vector<20x16xf32>
    %102 = vector.shape_cast %99 : vector<20x16xf32> to vector<1x20x1x16xf32>
    tpu.vector_store %arg15[%c0_96, %c0_97, %c2_98, %c0_99], %102 {strides = array<i32>} : memref<1x20x8x16xf32, #tpu.memory_space<vmem>>, vector<1x20x1x16xf32>,
    %103 = vector.extract_strided_slice %30 {offsets = [0, 0], sizes = [32, 9], strides = [1, 1]} : vector<32x27xbf16> to vector<32x9xbf16>
    %c9_100 = arith.constant 9 : index
    %c0_101 = arith.constant 0 : index
    %104 = vector.load %arg16[%c9_100, %c0_101] : memref<30x18xbf16, #tpu.memory_space<vmem>>, vector<9x16xbf16>
    %cst_102 = arith.constant dense<0.000000e+00> : vector<32x16xf32>
    %105 = tpu.matmul %103, %104, %cst_102 {dimension_numbers = #tpu.dot_dimension_numbers<[1], [0], [0], [1], [0, 0, 1, 1], [], []>} : vector<32x9xbf16>, vector<9x16xbf16>, vector<32x16xf32> -> vector<32x16xf32>
    %106 = vector.extract_strided_slice %30 {offsets = [0, 9], sizes = [32, 9], strides = [1, 1]} : vector<32x27xbf16> to vector<32x9xbf16>
    %c9_103 = arith.constant 9 : index
    %c1_104 = arith.constant 1 : index
    %107 = vector.load %arg16[%c9_103, %c1_104] : memref<30x18xbf16, #tpu.memory_space<vmem>>, vector<9x16xbf16>
    %cst_105 = arith.constant dense<0.000000e+00> : vector<32x16xf32>
    %108 = tpu.matmul %106, %107, %cst_105 {dimension_numbers = #tpu.dot_dimension_numbers<[1], [0], [0], [1], [0, 0, 1, 1], [], []>} : vector<32x9xbf16>, vector<9x16xbf16>, vector<32x16xf32> -> vector<32x16xf32>
    %109 = arith.addf %105, %108 : vector<32x16xf32>
    %110 = vector.extract_strided_slice %30 {offsets = [0, 18], sizes = [32, 9], strides = [1, 1]} : vector<32x27xbf16> to vector<32x9xbf16>
    %c9_106 = arith.constant 9 : index
    %c2_107 = arith.constant 2 : index
    %111 = vector.load %arg16[%c9_106, %c2_107] : memref<30x18xbf16, #tpu.memory_space<vmem>>, vector<9x16xbf16>
    %cst_108 = arith.constant dense<0.000000e+00> : vector<32x16xf32>
    %112 = tpu.matmul %110, %111, %cst_108 {dimension_numbers = #tpu.dot_dimension_numbers<[1], [0], [0], [1], [0, 0, 1, 1], [], []>} : vector<32x9xbf16>, vector<9x16xbf16>, vector<32x16xf32> -> vector<32x16xf32>
    %113 = arith.addf %109, %112 : vector<32x16xf32>
    %114 = vector.broadcast %32 : vector<32x1xf32> to vector<32x16xf32>
    %115 = arith.addf %113, %114 : vector<32x16xf32>
    %cst_109 = arith.constant 0.000000e+00 : f32
    %116 = vector.broadcast %cst_109 : f32 to vector<32x16xf32>
    %117 = arith.cmpf ogt, %115, %116 : vector<32x16xf32>
    %118 = vector.broadcast %33 : vector<32x1xf32> to vector<32x16xf32>
    %119 = arith.mulf %118, %115 : vector<32x16xf32>
    %120 = arith.select %117, %115, %119 : vector<32x16xi1>, vector<32x16xf32>
    %121 = arith.truncf %120 : vector<32x16xf32> to vector<32x16xbf16>
    %cst_110 = arith.constant dense<0.000000e+00> : vector<20x16xf32>
    %122 = tpu.matmul %31, %121, %cst_110 {dimension_numbers = #tpu.dot_dimension_numbers<[1], [0], [0], [1], [0, 0, 1, 1], [], []>} : vector<20x32xbf16>, vector<32x16xbf16>, vector<20x16xf32> -> vector<20x16xf32>
    %c0_111 = arith.constant 0 : index
    %c0_112 = arith.constant 0 : index
    %c3_113 = arith.constant 3 : index
    %c0_114 = arith.constant 0 : index
    %123 = vector.load %arg15[%c0_111, %c0_112, %c3_113, %c0_114] : memref<1x20x8x16xf32, #tpu.memory_space<vmem>>, vector<1x20x1x16xf32>
    %124 = vector.shape_cast %123 : vector<1x20x1x16xf32> to vector<20x16xf32>
    %125 = vector.shape_cast %122 : vector<20x16xf32> to vector<1x20x1x16xf32>
    tpu.vector_store %arg15[%c0_111, %c0_112, %c3_113, %c0_114], %125 {strides = array<i32>} : memref<1x20x8x16xf32, #tpu.memory_space<vmem>>, vector<1x20x1x16xf32>,
    %126 = vector.extract_strided_slice %30 {offsets = [0, 0], sizes = [32, 9], strides = [1, 1]} : vector<32x27xbf16> to vector<32x9xbf16>
    %c12_115 = arith.constant 12 : index
    %c0_116 = arith.constant 0 : index
    %127 = vector.load %arg16[%c12_115, %c0_116] : memref<30x18xbf16, #tpu.memory_space<vmem>>, vector<9x16xbf16>
    %cst_117 = arith.constant dense<0.000000e+00> : vector<32x16xf32>
    %128 = tpu.matmul %126, %127, %cst_117 {dimension_numbers = #tpu.dot_dimension_numbers<[1], [0], [0], [1], [0, 0, 1, 1], [], []>} : vector<32x9xbf16>, vector<9x16xbf16>, vector<32x16xf32> -> vector<32x16xf32>
    %129 = vector.extract_strided_slice %30 {offsets = [0, 9], sizes = [32, 9], strides = [1, 1]} : vector<32x27xbf16> to vector<32x9xbf16>
    %c12_118 = arith.constant 12 : index
    %c1_119 = arith.constant 1 : index
    %130 = vector.load %arg16[%c12_118, %c1_119] : memref<30x18xbf16, #tpu.memory_space<vmem>>, vector<9x16xbf16>
    %cst_120 = arith.constant dense<0.000000e+00> : vector<32x16xf32>
    %131 = tpu.matmul %129, %130, %cst_120 {dimension_numbers = #tpu.dot_dimension_numbers<[1], [0], [0], [1], [0, 0, 1, 1], [], []>} : vector<32x9xbf16>, vector<9x16xbf16>, vector<32x16xf32> -> vector<32x16xf32>
    %132 = arith.addf %128, %131 : vector<32x16xf32>
    %133 = vector.extract_strided_slice %30 {offsets = [0, 18], sizes = [32, 9], strides = [1, 1]} : vector<32x27xbf16> to vector<32x9xbf16>
    %c12_121 = arith.constant 12 : index
    %c2_122 = arith.constant 2 : index
    %134 = vector.load %arg16[%c12_121, %c2_122] : memref<30x18xbf16, #tpu.memory_space<vmem>>, vector<9x16xbf16>
    %cst_123 = arith.constant dense<0.000000e+00> : vector<32x16xf32>
    %135 = tpu.matmul %133, %134, %cst_123 {dimension_numbers = #tpu.dot_dimension_numbers<[1], [0], [0], [1], [0, 0, 1, 1], [], []>} : vector<32x9xbf16>, vector<9x16xbf16>, vector<32x16xf32> -> vector<32x16xf32>
    %136 = arith.addf %132, %135 : vector<32x16xf32>
    %137 = vector.broadcast %32 : vector<32x1xf32> to vector<32x16xf32>
    %138 = arith.addf %136, %137 : vector<32x16xf32>
    %cst_124 = arith.constant 0.000000e+00 : f32
    %139 = vector.broadcast %cst_124 : f32 to vector<32x16xf32>
    %140 = arith.cmpf ogt, %138, %139 : vector<32x16xf32>
    %141 = vector.broadcast %33 : vector<32x1xf32> to vector<32x16xf32>
    %142 = arith.mulf %141, %138 : vector<32x16xf32>
    %143 = arith.select %140, %138, %142 : vector<32x16xi1>, vector<32x16xf32>
    %144 = arith.truncf %143 : vector<32x16xf32> to vector<32x16xbf16>
    %cst_125 = arith.constant dense<0.000000e+00> : vector<20x16xf32>
    %145 = tpu.matmul %31, %144, %cst_125 {dimension_numbers = #tpu.dot_dimension_numbers<[1], [0], [0], [1], [0, 0, 1, 1], [], []>} : vector<20x32xbf16>, vector<32x16xbf16>, vector<20x16xf32> -> vector<20x16xf32>
    %c0_126 = arith.constant 0 : index
    %c0_127 = arith.constant 0 : index
    %c4 = arith.constant 4 : index
    %c0_128 = arith.constant 0 : index
    %146 = vector.load %arg15[%c0_126, %c0_127, %c4, %c0_128] : memref<1x20x8x16xf32, #tpu.memory_space<vmem>>, vector<1x20x1x16xf32>
    %147 = vector.shape_cast %146 : vector<1x20x1x16xf32> to vector<20x16xf32>
    %148 = vector.shape_cast %145 : vector<20x16xf32> to vector<1x20x1x16xf32>
    tpu.vector_store %arg15[%c0_126, %c0_127, %c4, %c0_128], %148 {strides = array<i32>} : memref<1x20x8x16xf32, #tpu.memory_space<vmem>>, vector<1x20x1x16xf32>,
    %149 = vector.extract_strided_slice %30 {offsets = [0, 0], sizes = [32, 9], strides = [1, 1]} : vector<32x27xbf16> to vector<32x9xbf16>
    %c15_129 = arith.constant 15 : index
    %c0_130 = arith.constant 0 : index
    %150 = vector.load %arg16[%c15_129, %c0_130] : memref<30x18xbf16, #tpu.memory_space<vmem>>, vector<9x16xbf16>
    %cst_131 = arith.constant dense<0.000000e+00> : vector<32x16xf32>
    %151 = tpu.matmul %149, %150, %cst_131 {dimension_numbers = #tpu.dot_dimension_numbers<[1], [0], [0], [1], [0, 0, 1, 1], [], []>} : vector<32x9xbf16>, vector<9x16xbf16>, vector<32x16xf32> -> vector<32x16xf32>
    %152 = vector.extract_strided_slice %30 {offsets = [0, 9], sizes = [32, 9], strides = [1, 1]} : vector<32x27xbf16> to vector<32x9xbf16>
    %c15_132 = arith.constant 15 : index
    %c1_133 = arith.constant 1 : index
    %153 = vector.load %arg16[%c15_132, %c1_133] : memref<30x18xbf16, #tpu.memory_space<vmem>>, vector<9x16xbf16>
    %cst_134 = arith.constant dense<0.000000e+00> : vector<32x16xf32>
    %154 = tpu.matmul %152, %153, %cst_134 {dimension_numbers = #tpu.dot_dimension_numbers<[1], [0], [0], [1], [0, 0, 1, 1], [], []>} : vector<32x9xbf16>, vector<9x16xbf16>, vector<32x16xf32> -> vector<32x16xf32>
    %155 = arith.addf %151, %154 : vector<32x16xf32>
    %156 = vector.extract_strided_slice %30 {offsets = [0, 18], sizes = [32, 9], strides = [1, 1]} : vector<32x27xbf16> to vector<32x9xbf16>
    %c15_135 = arith.constant 15 : index
    %c2_136 = arith.constant 2 : index
    %157 = vector.load %arg16[%c15_135, %c2_136] : memref<30x18xbf16, #tpu.memory_space<vmem>>, vector<9x16xbf16>
    %cst_137 = arith.constant dense<0.000000e+00> : vector<32x16xf32>
    %158 = tpu.matmul %156, %157, %cst_137 {dimension_numbers = #tpu.dot_dimension_numbers<[1], [0], [0], [1], [0, 0, 1, 1], [], []>} : vector<32x9xbf16>, vector<9x16xbf16>, vector<32x16xf32> -> vector<32x16xf32>
    %159 = arith.addf %155, %158 : vector<32x16xf32>
    %160 = vector.broadcast %32 : vector<32x1xf32> to vector<32x16xf32>
    %161 = arith.addf %159, %160 : vector<32x16xf32>
    %cst_138 = arith.constant 0.000000e+00 : f32
    %162 = vector.broadcast %cst_138 : f32 to vector<32x16xf32>
    %163 = arith.cmpf ogt, %161, %162 : vector<32x16xf32>
    %164 = vector.broadcast %33 : vector<32x1xf32> to vector<32x16xf32>
    %165 = arith.mulf %164, %161 : vector<32x16xf32>
    %166 = arith.select %163, %161, %165 : vector<32x16xi1>, vector<32x16xf32>
    %167 = arith.truncf %166 : vector<32x16xf32> to vector<32x16xbf16>
    %cst_139 = arith.constant dense<0.000000e+00> : vector<20x16xf32>
    %168 = tpu.matmul %31, %167, %cst_139 {dimension_numbers = #tpu.dot_dimension_numbers<[1], [0], [0], [1], [0, 0, 1, 1], [], []>} : vector<20x32xbf16>, vector<32x16xbf16>, vector<20x16xf32> -> vector<20x16xf32>
    %c0_140 = arith.constant 0 : index
    %c0_141 = arith.constant 0 : index
    %c5 = arith.constant 5 : index
    %c0_142 = arith.constant 0 : index
    %169 = vector.load %arg15[%c0_140, %c0_141, %c5, %c0_142] : memref<1x20x8x16xf32, #tpu.memory_space<vmem>>, vector<1x20x1x16xf32>
    %170 = vector.shape_cast %169 : vector<1x20x1x16xf32> to vector<20x16xf32>
    %171 = vector.shape_cast %168 : vector<20x16xf32> to vector<1x20x1x16xf32>
    tpu.vector_store %arg15[%c0_140, %c0_141, %c5, %c0_142], %171 {strides = array<i32>} : memref<1x20x8x16xf32, #tpu.memory_space<vmem>>, vector<1x20x1x16xf32>,
    %172 = vector.extract_strided_slice %30 {offsets = [0, 0], sizes = [32, 9], strides = [1, 1]} : vector<32x27xbf16> to vector<32x9xbf16>
    %c18_143 = arith.constant 18 : index
    %c0_144 = arith.constant 0 : index
    %173 = vector.load %arg16[%c18_143, %c0_144] : memref<30x18xbf16, #tpu.memory_space<vmem>>, vector<9x16xbf16>
    %cst_145 = arith.constant dense<0.000000e+00> : vector<32x16xf32>
    %174 = tpu.matmul %172, %173, %cst_145 {dimension_numbers = #tpu.dot_dimension_numbers<[1], [0], [0], [1], [0, 0, 1, 1], [], []>} : vector<32x9xbf16>, vector<9x16xbf16>, vector<32x16xf32> -> vector<32x16xf32>
    %175 = vector.extract_strided_slice %30 {offsets = [0, 9], sizes = [32, 9], strides = [1, 1]} : vector<32x27xbf16> to vector<32x9xbf16>
    %c18_146 = arith.constant 18 : index
    %c1_147 = arith.constant 1 : index
    %176 = vector.load %arg16[%c18_146, %c1_147] : memref<30x18xbf16, #tpu.memory_space<vmem>>, vector<9x16xbf16>
    %cst_148 = arith.constant dense<0.000000e+00> : vector<32x16xf32>
    %177 = tpu.matmul %175, %176, %cst_148 {dimension_numbers = #tpu.dot_dimension_numbers<[1], [0], [0], [1], [0, 0, 1, 1], [], []>} : vector<32x9xbf16>, vector<9x16xbf16>, vector<32x16xf32> -> vector<32x16xf32>
    %178 = arith.addf %174, %177 : vector<32x16xf32>
    %179 = vector.extract_strided_slice %30 {offsets = [0, 18], sizes = [32, 9], strides = [1, 1]} : vector<32x27xbf16> to vector<32x9xbf16>
    %c18_149 = arith.constant 18 : index
    %c2_150 = arith.constant 2 : index
    %180 = vector.load %arg16[%c18_149, %c2_150] : memref<30x18xbf16, #tpu.memory_space<vmem>>, vector<9x16xbf16>
    %cst_151 = arith.constant dense<0.000000e+00> : vector<32x16xf32>
    %181 = tpu.matmul %179, %180, %cst_151 {dimension_numbers = #tpu.dot_dimension_numbers<[1], [0], [0], [1], [0, 0, 1, 1], [], []>} : vector<32x9xbf16>, vector<9x16xbf16>, vector<32x16xf32> -> vector<32x16xf32>
    %182 = arith.addf %178, %181 : vector<32x16xf32>
    %183 = vector.broadcast %32 : vector<32x1xf32> to vector<32x16xf32>
    %184 = arith.addf %182, %183 : vector<32x16xf32>
    %cst_152 = arith.constant 0.000000e+00 : f32
    %185 = vector.broadcast %cst_152 : f32 to vector<32x16xf32>
    %186 = arith.cmpf ogt, %184, %185 : vector<32x16xf32>
    %187 = vector.broadcast %33 : vector<32x1xf32> to vector<32x16xf32>
    %188 = arith.mulf %187, %184 : vector<32x16xf32>
    %189 = arith.select %186, %184, %188 : vector<32x16xi1>, vector<32x16xf32>
    %190 = arith.truncf %189 : vector<32x16xf32> to vector<32x16xbf16>
    %cst_153 = arith.constant dense<0.000000e+00> : vector<20x16xf32>
    %191 = tpu.matmul %31, %190, %cst_153 {dimension_numbers = #tpu.dot_dimension_numbers<[1], [0], [0], [1], [0, 0, 1, 1], [], []>} : vector<20x32xbf16>, vector<32x16xbf16>, vector<20x16xf32> -> vector<20x16xf32>
    %c0_154 = arith.constant 0 : index
    %c0_155 = arith.constant 0 : index
    %c6_156 = arith.constant 6 : index
    %c0_157 = arith.constant 0 : index
    %192 = vector.load %arg15[%c0_154, %c0_155, %c6_156, %c0_157] : memref<1x20x8x16xf32, #tpu.memory_space<vmem>>, vector<1x20x1x16xf32>
    %193 = vector.shape_cast %192 : vector<1x20x1x16xf32> to vector<20x16xf32>
    %194 = vector.shape_cast %191 : vector<20x16xf32> to vector<1x20x1x16xf32>
    tpu.vector_store %arg15[%c0_154, %c0_155, %c6_156, %c0_157], %194 {strides = array<i32>} : memref<1x20x8x16xf32, #tpu.memory_space<vmem>>, vector<1x20x1x16xf32>,
    %195 = vector.extract_strided_slice %30 {offsets = [0, 0], sizes = [32, 9], strides = [1, 1]} : vector<32x27xbf16> to vector<32x9xbf16>
    %c21_158 = arith.constant 21 : index
    %c0_159 = arith.constant 0 : index
    %196 = vector.load %arg16[%c21_158, %c0_159] : memref<30x18xbf16, #tpu.memory_space<vmem>>, vector<9x16xbf16>
    %cst_160 = arith.constant dense<0.000000e+00> : vector<32x16xf32>
    %197 = tpu.matmul %195, %196, %cst_160 {dimension_numbers = #tpu.dot_dimension_numbers<[1], [0], [0], [1], [0, 0, 1, 1], [], []>} : vector<32x9xbf16>, vector<9x16xbf16>, vector<32x16xf32> -> vector<32x16xf32>
    %198 = vector.extract_strided_slice %30 {offsets = [0, 9], sizes = [32, 9], strides = [1, 1]} : vector<32x27xbf16> to vector<32x9xbf16>
    %c21_161 = arith.constant 21 : index
    %c1_162 = arith.constant 1 : index
    %199 = vector.load %arg16[%c21_161, %c1_162] : memref<30x18xbf16, #tpu.memory_space<vmem>>, vector<9x16xbf16>
    %cst_163 = arith.constant dense<0.000000e+00> : vector<32x16xf32>
    %200 = tpu.matmul %198, %199, %cst_163 {dimension_numbers = #tpu.dot_dimension_numbers<[1], [0], [0], [1], [0, 0, 1, 1], [], []>} : vector<32x9xbf16>, vector<9x16xbf16>, vector<32x16xf32> -> vector<32x16xf32>
    %201 = arith.addf %197, %200 : vector<32x16xf32>
    %202 = vector.extract_strided_slice %30 {offsets = [0, 18], sizes = [32, 9], strides = [1, 1]} : vector<32x27xbf16> to vector<32x9xbf16>
    %c21_164 = arith.constant 21 : index
    %c2_165 = arith.constant 2 : index
    %203 = vector.load %arg16[%c21_164, %c2_165] : memref<30x18xbf16, #tpu.memory_space<vmem>>, vector<9x16xbf16>
    %cst_166 = arith.constant dense<0.000000e+00> : vector<32x16xf32>
    %204 = tpu.matmul %202, %203, %cst_166 {dimension_numbers = #tpu.dot_dimension_numbers<[1], [0], [0], [1], [0, 0, 1, 1], [], []>} : vector<32x9xbf16>, vector<9x16xbf16>, vector<32x16xf32> -> vector<32x16xf32>
    %205 = arith.addf %201, %204 : vector<32x16xf32>
    %206 = vector.broadcast %32 : vector<32x1xf32> to vector<32x16xf32>
    %207 = arith.addf %205, %206 : vector<32x16xf32>
    %cst_167 = arith.constant 0.000000e+00 : f32
    %208 = vector.broadcast %cst_167 : f32 to vector<32x16xf32>
    %209 = arith.cmpf ogt, %207, %208 : vector<32x16xf32>
    %210 = vector.broadcast %33 : vector<32x1xf32> to vector<32x16xf32>
    %211 = arith.mulf %210, %207 : vector<32x16xf32>
    %212 = arith.select %209, %207, %211 : vector<32x16xi1>, vector<32x16xf32>
    %213 = arith.truncf %212 : vector<32x16xf32> to vector<32x16xbf16>
    %cst_168 = arith.constant dense<0.000000e+00> : vector<20x16xf32>
    %214 = tpu.matmul %31, %213, %cst_168 {dimension_numbers = #tpu.dot_dimension_numbers<[1], [0], [0], [1], [0, 0, 1, 1], [], []>} : vector<20x32xbf16>, vector<32x16xbf16>, vector<20x16xf32> -> vector<20x16xf32>
    %c0_169 = arith.constant 0 : index
    %c0_170 = arith.constant 0 : index
    %c7 = arith.constant 7 : index
    %c0_171 = arith.constant 0 : index
    %215 = vector.load %arg15[%c0_169, %c0_170, %c7, %c0_171] : memref<1x20x8x16xf32, #tpu.memory_space<vmem>>, vector<1x20x1x16xf32>
    %216 = vector.shape_cast %215 : vector<1x20x1x16xf32> to vector<20x16xf32>
    %217 = vector.shape_cast %214 : vector<20x16xf32> to vector<1x20x1x16xf32>
    tpu.vector_store %arg15[%c0_169, %c0_170, %c7, %c0_171], %217 {strides = array<i32>} : memref<1x20x8x16xf32, #tpu.memory_space<vmem>>, vector<1x20x1x16xf32>,
    return
  }
  func.func @transform_0(%arg0: i32, %arg1: i32) -> (i32, i32, i32, i32) {
    %c8_i32 = arith.constant 8 : i32
    %0 = arith.muli %arg1, %c8_i32 : i32
    %c0_i32 = arith.constant 0 : i32
    %1 = arith.addi %0, %c0_i32 : i32
    %c0_i32_0 = arith.constant 0 : i32
    %c0_i32_1 = arith.constant 0 : i32
    %c0_i32_2 = arith.constant 0 : i32
    return %arg0, %1, %c0_i32_0, %c0_i32_1 : i32, i32, i32, i32
  }
  func.func @transform_1(%arg0: i32, %arg1: i32) -> (i32, i32, i32, i32) {
    %c8_i32 = arith.constant 8 : i32
    %0 = arith.muli %arg1, %c8_i32 : i32
    %c1_i32 = arith.constant 1 : i32
    %1 = arith.addi %0, %c1_i32 : i32
    %c0_i32 = arith.constant 0 : i32
    %c0_i32_0 = arith.constant 0 : i32
    %c0_i32_1 = arith.constant 0 : i32
    return %arg0, %1, %c0_i32, %c0_i32_0 : i32, i32, i32, i32
  }
  func.func @transform_2(%arg0: i32, %arg1: i32) -> (i32, i32, i32, i32) {
    %c8_i32 = arith.constant 8 : i32
    %0 = arith.muli %arg1, %c8_i32 : i32
    %c2_i32 = arith.constant 2 : i32
    %1 = arith.addi %0, %c2_i32 : i32
    %c0_i32 = arith.constant 0 : i32
    %c0_i32_0 = arith.constant 0 : i32
    %c0_i32_1 = arith.constant 0 : i32
    return %arg0, %1, %c0_i32, %c0_i32_0 : i32, i32, i32, i32
  }
  func.func @transform_3(%arg0: i32, %arg1: i32) -> (i32, i32, i32, i32) {
    %c8_i32 = arith.constant 8 : i32
    %0 = arith.muli %arg1, %c8_i32 : i32
    %c3_i32 = arith.constant 3 : i32
    %1 = arith.addi %0, %c3_i32 : i32
    %c0_i32 = arith.constant 0 : i32
    %c0_i32_0 = arith.constant 0 : i32
    %c0_i32_1 = arith.constant 0 : i32
    return %arg0, %1, %c0_i32, %c0_i32_0 : i32, i32, i32, i32
  }
  func.func @transform_4(%arg0: i32, %arg1: i32) -> (i32, i32, i32, i32) {
    %c8_i32 = arith.constant 8 : i32
    %0 = arith.muli %arg1, %c8_i32 : i32
    %c4_i32 = arith.constant 4 : i32
    %1 = arith.addi %0, %c4_i32 : i32
    %c0_i32 = arith.constant 0 : i32
    %c0_i32_0 = arith.constant 0 : i32
    %c0_i32_1 = arith.constant 0 : i32
    return %arg0, %1, %c0_i32, %c0_i32_0 : i32, i32, i32, i32
  }
  func.func @transform_5(%arg0: i32, %arg1: i32) -> (i32, i32, i32, i32) {
    %c8_i32 = arith.constant 8 : i32
    %0 = arith.muli %arg1, %c8_i32 : i32
    %c5_i32 = arith.constant 5 : i32
    %1 = arith.addi %0, %c5_i32 : i32
    %c0_i32 = arith.constant 0 : i32
    %c0_i32_0 = arith.constant 0 : i32
    %c0_i32_1 = arith.constant 0 : i32
    return %arg0, %1, %c0_i32, %c0_i32_0 : i32, i32, i32, i32
  }
  func.func @transform_6(%arg0: i32, %arg1: i32) -> (i32, i32, i32, i32) {
    %c8_i32 = arith.constant 8 : i32
    %0 = arith.muli %arg1, %c8_i32 : i32
    %c6_i32 = arith.constant 6 : i32
    %1 = arith.addi %0, %c6_i32 : i32
    %c0_i32 = arith.constant 0 : i32
    %c0_i32_0 = arith.constant 0 : i32
    %c0_i32_1 = arith.constant 0 : i32
    return %arg0, %1, %c0_i32, %c0_i32_0 : i32, i32, i32, i32
  }
  func.func @transform_7(%arg0: i32, %arg1: i32) -> (i32, i32, i32, i32) {
    %c8_i32 = arith.constant 8 : i32
    %0 = arith.muli %arg1, %c8_i32 : i32
    %c7_i32 = arith.constant 7 : i32
    %1 = arith.addi %0, %c7_i32 : i32
    %c0_i32 = arith.constant 0 : i32
    %c0_i32_0 = arith.constant 0 : i32
    %c0_i32_1 = arith.constant 0 : i32
    return %arg0, %1, %c0_i32, %c0_i32_0 : i32, i32, i32, i32
  }
  func.func @transform_8(%arg0: i32, %arg1: i32) -> (i32, i32, i32, i32) {
    %c8_i32 = arith.constant 8 : i32
    %0 = arith.muli %arg1, %c8_i32 : i32
    %c8_i32_0 = arith.constant 8 : i32
    %1 = arith.addi %0, %c8_i32_0 : i32
    %c0_i32 = arith.constant 0 : i32
    %c0_i32_1 = arith.constant 0 : i32
    %c0_i32_2 = arith.constant 0 : i32
    return %arg0, %1, %c0_i32, %c0_i32_1 : i32, i32, i32, i32
  }
  func.func @transform_9(%arg0: i32, %arg1: i32) -> (i32, i32, i32, i32) {
    %c8_i32 = arith.constant 8 : i32
    %0 = arith.muli %arg1, %c8_i32 : i32
    %c9_i32 = arith.constant 9 : i32
    %1 = arith.addi %0, %c9_i32 : i32
    %c0_i32 = arith.constant 0 : i32
    %c0_i32_0 = arith.constant 0 : i32
    %c0_i32_1 = arith.constant 0 : i32
    return %arg0, %1, %c0_i32, %c0_i32_0 : i32, i32, i32, i32
  }
  func.func @transform_10(%arg0: i32, %arg1: i32) -> (i32, i32) {
    %c0_i32 = arith.constant 0 : i32
    %c0_i32_0 = arith.constant 0 : i32
    %c0_i32_1 = arith.constant 0 : i32
    return %c0_i32, %c0_i32_0 : i32, i32
  }
  func.func @transform_11(%arg0: i32, %arg1: i32) -> (i32, i32) {
    %c0_i32 = arith.constant 0 : i32
    %c0_i32_0 = arith.constant 0 : i32
    %c0_i32_1 = arith.constant 0 : i32
    return %c0_i32, %c0_i32_0 : i32, i32
  }
  func.func @transform_12(%arg0: i32, %arg1: i32) -> (i32, i32) {
    %c0_i32 = arith.constant 0 : i32
    %c0_i32_0 = arith.constant 0 : i32
    %c0_i32_1 = arith.constant 0 : i32
    return %c0_i32, %c0_i32_0 : i32, i32
  }
  func.func @transform_13(%arg0: i32, %arg1: i32) -> (i32, i32, i32, i32) {
    %c0_i32 = arith.constant 0 : i32
    %c0_i32_0 = arith.constant 0 : i32
    %c0_i32_1 = arith.constant 0 : i32
    return %arg0, %c0_i32, %arg1, %c0_i32_0 : i32, i32, i32, i32
  }
}

</mosaic_0001>

<bundles_post_ra>
// kernel: tpu_custom_call.1
= control target key start
LH: loop header
LB: loop body
LE: loop exit
PB: predicated region body
PF: predicated region fallthrough
CT: control target
= control target key end

     0   :  { %s4174_s0 = inlined_call_operand.vmem [shape: bf16[2,18,3,18], index: 0, kind: input, shape index: {}]   ;;  %s4175_s1 = inlined_call_operand.vmem [shape: bf16[2,18,3,18], index: 1, kind: input, shape index: {}]   ;;  %s4176_s2 = inlined_call_operand.vmem [shape: bf16[2,18,3,18], index: 2, kind: input, shape index: {}]   ;;  %s4177_s3 = inlined_call_operand.vmem [shape: bf16[2,18,3,18], index: 3, kind: input, shape index: {}]   ;;  %s4178_s4 = inlined_call_operand.vmem [shape: bf16[2,18,3,18], index: 4, kind: input, shape index: {}]   ;;  %s4179_s5 = inlined_call_operand.vmem [shape: bf16[2,18,3,18], index: 5, kind: input, shape index: {}]   ;;  %s4180_s6 = inlined_call_operand.vmem [shape: bf16[2,18,3,18], index: 6, kind: input, shape index: {}]   ;;  %s4181_s7 = inlined_call_operand.vmem [shape: bf16[2,18,3,18], index: 7, kind: input, shape index: {}]   ;;  %s4182_s8 = inlined_call_operand.vmem [shape: bf16[2,18,3,18], index: 8, kind: input, shape index: {}]   ;;  %s4183_s9 = inlined_call_operand.vmem [shape: bf16[2,18,3,18], index: 9, kind: input, shape index: {}]   ;;  %s4184_s10 = inlined_call_operand.vmem [shape: bf16[32,27], index: 10, kind: input, shape index: {}]   ;;  %s4185_s11 = inlined_call_operand.vmem [shape: f32[32,2], index: 11, kind: input, shape index: {}]   ;;  %s4186_s12 = inlined_call_operand.vmem [shape: bf16[20,32], index: 12, kind: input, shape index: {}]   ;;  %s4187_s13 = inlined_call_operand.vmem [shape: f32[2,20,16,16], index: 13, kind: output, shape index: {}]  }
   0x1   :  { %4196 = sst [smem:[#allocation13_spill]] %s4187_s13 }
   0x2   :  { %s3267_s25 = smov 0   ;;  %s3269_s26 = smov 0  }
   0x3   :  { %s3271_s27 = smov 0   ;;  %s3273_s28 = smov 0  }
   0x4   :  { %s3275_s29 = smov 0   ;;  %s3277_s30 = smov 0  }
   0x5   :  { %s3279_s14 = smov 0  }
   0x6 LB: > { %4197 = sst [smem:[#allocation4_spill]] %s3168_s26  ;;  %s32_s15 = sadd.s32 1, %s3180_s29  ;;  %s3188_s14 = sphi %s3279_s14, %s23_s14   ;;  %s3184_s30 = sphi %s3277_s30, %s4220_s30   ;;  %s3180_s29 = sphi %s3275_s29, %s4219_s29   ;;  %s3176_s28 = sphi %s3273_s28, %s4218_s28   ;;  %s3172_s27 = sphi %s3271_s27, %s4217_s27   ;;  %s3168_s26 = sphi %s3269_s26, %s4216_s26   ;;  %s3164_s25 = sphi %s3267_s25, %s4215_s25  }
   0x7   : > { %4198 = sst [smem:[#allocation5_spill]] %s3172_s27  ;;  %p33_p0 = scmp.ge.s32.totalorder %s32_s15, 2 }
   0x8   : > { %4199 = sst [smem:[#allocation6_spill]] %s3176_s28  ;;  %s35_s16 = sadd.s32 1, %s3184_s30 }
   0x9   : > { %4200 = sst [smem:[#allocation7_spill]] %s3180_s29  ;;  %s2895_s17 = sadd.s32 4294967295, %s3188_s14  }
   0xa   : > { %4201 = sst [smem:[#allocation8_spill]] %s3184_s30  ;;  %p435_p1 = scmp.ne.s32.totalorder %s3168_s26, %s3164_s25 }
   0xb   : > { %4202 = sst [smem:[#allocation9_spill]] %s3188_s14  ;;  %s4222_s15 = smov (%p33_p0, %s32_s15), 0 }
   0xc   : > { %4203 = sst [smem:[#allocation10_spill]] %s4222_s15  ;;  %s4224_s16 = smov (!%p33_p0, %s35_s16), %s3184_s30 }
   0xd   : > { %s421_s18 = ssub.s32 %s3180_s29, %s4222_s15  ;;  %p436_p2 = scmp.eq.s32.totalorder %s2895_s17, 3 }
   0xe   : > { %p37_p3 = scmp.ge.s32.totalorder %s4224_s16, 2  ;;  %p2919_p4 = scmp.ge.s32.totalorder %s3188_s14, 1 }
   0xf   : > { %p3313_p5 = por %p436_p2, %p435_p1  ;;  %p617_p6 = scmp.lt.s32.totalorder %s3188_s14, 5 }
  0x10   : > { %s4226_s16 = smov (%p37_p3, %s4224_s16), 0  ;;  %s425_s22 = sadd.s32 1, %s3168_s26 }
  0x11   : > { %4205 = sst [smem:[#allocation11_spill]] %s4226_s16  ;;  %p618_p7 = pnand %p2919_p4, %p617_p6 }
  0x12   : > { %s420_s20 = ssub.s32 %s3184_s30, %s4226_s16  ;;  %s3327_s24 = sshll.u32 (!%p618_p7), %s3172_s27, 3 }
  0x13   : > { %s422_s21 = sor.u32 %s421_s18, %s420_s20  ;;  %p755_p9 = scmp.lt.s32.totalorder (!%p618_p7), %s3176_s28, 1 }
  0x14   : > { %p423_p8 = scmp.eq.s32.totalorder %s422_s21, 0  ;;  %621 = sbr.rel (%p618_p7) target bundleno = 769 (0x301), region = 72 }
  0x15   : > { %p757_p10 = scmp.lt.s32.totalorder (!%p618_p7), %s3327_s24, 17  ;;  %s765_s17 = sadd.s32 (!%p618_p7), 1, %s3327_s24 }
  0x16   : > { %s3324_s23 = scalar_select %p423_p8, %s3168_s26, %s425_s22  }
  0x17   : > { %p768_p11 = scmp.lt.s32.totalorder (!%p618_p7), %s765_s17, 17  ;;  %s777_s21 = sadd.s32 (!%p618_p7), 2, %s3327_s24 }
  0x18   : > { %4206 = sst [smem:[#allocation12_spill]] %s3324_s23  ;;  %p780_p12 = scmp.lt.s32.totalorder (!%p618_p7), %s777_s21, 17 }
  0x19   : > { %s756_s16 = scalar_select %p755_p9, %s3176_s28, 1  ;;  %vm874_vm0 = vcmask 140288   ;;  %vm875_vm1 = vsmask.f32 1280  ;;  %v877_v1 = vld [vmem:[#allocation2] sm:$0x3] }
  0x1a   : > { %s758_s18 = scalar_select %p757_p10, %s3327_s24, 17  ;;  %vm3339_vm2 = vmand %vm874_vm0, %vm875_vm1  ;;  %vm893_vm3 = vsmask.f32 7942  ;;  %vm892_vm4 = vcmask 141313   ;;  %v3362_v9 = vld [vmem:[%s4184_s10] sm:$0xff]  ;;  %vm907_vm6 = vcmask 142339  }
  0x1b   : > { %s3334_s20 = smul.u32 18, %s756_s16  ;;  %s789_s23 = sadd.s32 3, %s3327_s24  ;;  %vm3370_vm5 = vmand %vm892_vm4, %vm893_vm3  ;;  %vm909_vm7 = vcmask 139264   ;;  %vm910_vm8 = vsmask.f32 256  ;;  %v3390_v26 = vld [vmem:[%s4184_s10 + $0x8] sm:$0xff] }
  0x1c   : > { %s4228_s17 = smov (!%p768_p11, %s765_s17), 17  ;;  %s4230_s21 = smov (!%p780_p12, %s777_s21), 17  ;;  %vm911_vm9 = vmand %vm909_vm7, %vm910_vm8  ;;  %v912_v19 = vld [vmem:[#allocation2 + $0x4] sm:$0x1]  ;;  %vm926_vm10 = vsmask.f32 7938 }
  0x1d   : > { %s760_s22 = sadd.s32 %s3334_s20, %s758_s18  ;;  %s771_s18 = sadd.s32 %s3334_s20, %s4228_s17  ;;  %vm937_vm11 = vcmask 142338   ;;  %vm938_vm12 = vsmask.f32 3328  ;;  %vm927_vm13 = vmand %vm874_vm0, %vm926_vm10  ;;  %v940_v30 = vld [vmem:[#allocation2 + $0x4] sm:$0xc]  ;;  %vm1054_vm8 = vcmask 1043456  }
  0x1e   : > { %s2921_s15 = sshll.u32 %s760_s22, 1  ;;  %p792_p13 = scmp.lt.s32.totalorder %s789_s23, 17  ;;  %vm939_vm14 = vmand %vm937_vm11, %vm938_vm12  ;;  %vm958_vm15 = vsmask.f32 7950  ;;  %vm972_vm1 = vsmask.f32 2304 }
  0x1f   : > { %s762_s29 = scalar_lea.vmem %s4174_s0, %s2921_s15  ;;  %s2923_s22 = sshll.u32 %s771_s18, 1  ;;  %vm959_vm0 = vmand %vm907_vm6, %vm958_vm15  ;;  %vm1208_vm12 = vcmask 261120  }
  0x20   : > { %v873_v2 = vld [vmem:[%s762_s29] sm:$0x3]  ;;  %s783_s26 = sadd.s32 %s3334_s20, %s4230_s21  ;;  %s773_s27 = scalar_lea.vmem %s4175_s1, %s2923_s22  ;;  %vm973_vm3 = vmand %vm892_vm4, %vm972_vm1  ;;  %vm1047_vm4 = vcmask 72704  }
  0x21   : > { %v878_v3 = vsel %vm3339_vm2, %v873_v2, %v877_v1  ;;  %s2925_s28 = sshll.u32 %s783_s26, 1  ;;  %s801_s30 = sadd.s32 4, %s3327_s24  ;;  %v880_v4 = vld [vmem:[%s773_s27] sm:$0x3] }
  0x22   : > { %879 = vst [vmem:[#allocation2] sm:$0x3] %v878_v3  ;;  %s4232_s23 = smov (!%p792_p13, %s789_s23), 17  ;;  %s785_s16 = scalar_lea.vmem %s4176_s2, %s2925_s28 }
  0x23   : > { %882 = vst [vmem:[#allocation1] ss:$2 sm:$0xff] %v880_v4  ;;  %p804_p0 = scmp.lt.s32.totalorder %s801_s30, 17  ;;  %s795_s17 = sadd.s32 %s3334_s20, %s4232_s23  ;;  %v898_v5 = vld [vmem:[%s785_s16] sm:$0x3] }
  0x24   : > { %s2927_s21 = sshll.u32 %s795_s17, 1  ;;  %s813_s27 = sadd.s32 5, %s3327_s24 }
  0x25   : > { %s4234_s30 = smov (!%p804_p0, %s801_s30), 17  ;;  %s797_s18 = scalar_lea.vmem %s4177_s3, %s2927_s21 }
  0x26   : > { %s807_s23 = sadd.s32 %s3334_s20, %s4234_s30  ;;  %s3190_s22 = smov 110   ;;  %v915_v15 = vld [vmem:[%s797_s18] sm:$0x3] }
  0x27   : > { %1108 = vrot.lane.b32.xlu1 %v3362_v9, %s3190_s22  ;;  %p816_p1 = scmp.lt.s32.totalorder %s813_s27, 17  ;;  %s2929_s29 = sshll.u32 %s807_s23, 1  ;;  %1110 = vrot.lane.b32.xlu2 %v3390_v26, %s3190_s22 }
  0x28   : > { %s825_s30 = sadd.s32 6, %s3327_s24  ;;  %s809_s17 = scalar_lea.vmem %s4178_s4, %s2929_s29 }
  0x29   : > { %v895_v13 = vld [vmem:[#allocation2] sm:$0x6]  ;;  %s4236_s27 = smov (!%p816_p1, %s813_s27), 17  ;;  %s3191_s21 = smov 119   ;;  %v931_v22 = vld [vmem:[%s809_s17] sm:$0x3] }
  0x2a   : > { %v883_v6 = vld.sshfl [vmem:[#allocation1] sm:$0xff pattern:$0x75643120]  ;;  %s819_s13 = sadd.s32 %s3334_s20, %s4236_s27  ;;  %p828_p2 = scmp.lt.s32.totalorder %s825_s30, 17 }
  0x2b   : > { %v884_v7 = vshrl.u32 %v883_v6, 16  ;;  %v887_v8 = vshll.u32 %v883_v6, 16  ;;  %900 = vst [vmem:[#allocation1] ss:$2 sm:$0xff] %v898_v5  ;;  %s2931_s26 = sshll.u32 %s819_s13, 1  ;;  %s3192_s22 = smov 126  }
  0x2c   : > { %s4238_s30 = smov (!%p828_p2, %s825_s30), 17  ;;  %s821_s27 = scalar_lea.vmem %s4179_s5, %s2931_s26 }
  0x2d   : > { %v886_v10 = vrot.slane %v884_v7, 6  ;;  %v889_v11 = vrot.slane %v887_v8, 7  ;;  %s831_s29 = sadd.s32 %s3334_s20, %s4238_s30  ;;  %v943_v31 = vld [vmem:[%s821_s27] sm:$0x3]  ;;  %s3193_s30 = smov 127  }
  0x2e   : > { %s2933_s15 = sshll.u32 %s831_s29, 1  ;;  %s861_s27 = sadd.s32 9, %s3327_s24  ;;  %v974_v7 = vld [vmem:[#allocation2 + $0x8] sm:$0x6] }
  0x2f   : > { %v890_v14 = vor.u32 %v889_v11, %v886_v10  ;;  %1036 = vrot.lane.b32.xlu1 %v3362_v9, %s3191_s21  ;;  %s833_s13 = scalar_lea.vmem %s4180_s6, %s2933_s15  ;;  %1038 = vrot.lane.b32.xlu2 %v3390_v26, %s3191_s21  ;;  %s837_s21 = sadd.s32 7, %s3327_s24 }
  0x30   : > { %v965_v37 = vld [vmem:[%s833_s13] sm:$0x3]  ;;  %p840_p3 = scmp.lt.s32.totalorder %s837_s21, 17  ;;  %p864_p4 = scmp.lt.s32.totalorder %s861_s27, 17 }
  0x31   : > { %v896_v16 = vsel %vm3370_vm5, %v890_v14, %v895_v13  ;;  %s4213_s19 = sld [smem:[#allocation13_spill]] (%p3313_p5) }
  0x32   : > { %897 = vst [vmem:[#allocation2] sm:$0x6] %v896_v16  ;;  %v901_v17 = vld.sshfl [vmem:[#allocation1] sm:$0xff pattern:$0x75643120]  ;;  %s4240_s21 = smov (!%p840_p3, %s837_s21), 17 }
  0x33   : > { %v903_v18 = vrot.slane %v901_v17, 5  ;;  %917 = vst [vmem:[#allocation1] ss:$2 sm:$0xff] %v915_v15  ;;  %s843_s26 = sadd.s32 %s3334_s20, %s4240_s21  ;;  %s4242_s27 = smov (!%p864_p4, %s861_s27), 17 }
  0x34   : > { %s2935_s14 = sshll.u32 %s843_s26, 1  ;;  %s867_s29 = sadd.s32 %s3334_s20, %s4242_s27 }
  0x35   : > { %v904_v20 = vrot.slane %v903_v18, 4  ;;  %908 = vst.msk [vmem:[#allocation2] sm:$0x8] %vm907_vm6, %v903_v18  ;;  %s845_s23 = scalar_lea.vmem %s4181_s7, %s2935_s14  ;;  %vm989_vm6 = vsmask.f32 7946  ;;  %s2939_s15 = sshll.u32 %s867_s29, 1 }
  0x36   : > { %v977_v5 = vld [vmem:[%s845_s23] sm:$0x3]  ;;  %s869_s13 = scalar_lea.vmem %s4183_s9, %s2939_s15  ;;  %s849_s15 = sadd.s32 8, %s3327_s24 }
  0x37   : > { %v913_v21 = vsel %vm911_vm9, %v904_v20, %v912_v19  ;;  %vm1055_vm9 = vcmask 1044480   ;;  %v3194_v19 = vmov 65535   ;;  %p852_p6 = scmp.lt.s32.totalorder %s849_s15, 17  ;;  %s751_s14 = sand.u32 1, %s3164_s25  }
  0x38   : > { %914 = vst [vmem:[#allocation2 + $0x4] sm:$0x1] %v913_v21  ;;  %v1056_v20 = vsel %vm1054_vm8, 4294967295, %v3194_v19  ;;  %s3062_s28 = smul.u32 160, %s751_s14  ;;  %s4211_s25 = sld [smem:[#allocation6_spill]] (%p3313_p5) }
  0x39   : > { %v3440_v21 = vsel %vm1055_vm9, %v1056_v20, 0  ;;  %s4244_s15 = smov (!%p852_p6, %s849_s15), 17  ;;  %s4212_s23 = sld [smem:[#allocation5_spill]] (%p3313_p5) }
  0x3a   : > { %v918_v23 = vld.sshfl [vmem:[#allocation1] sm:$0xff pattern:$0x75643120]  ;;  %s855_s24 = sadd.s32 %s3334_s20, %s4244_s15  ;;  %s3740_s18 = scalar_lea.vmem [#allocation3], %s3062_s28 }
  0x3b   : > { %v919_v24 = vshrl.u32 %v918_v23, 16  ;;  %v922_v25 = vshll.u32 %v918_v23, 16  ;;  %934 = vst [vmem:[#allocation1 + $0x1] ss:$2 sm:$0xff] %v931_v22  ;;  %s2937_s16 = sshll.u32 %s855_s24, 1 }
  0x3c   : > { %v2950_v35 = vld [vmem:[#allocation2] sm:$0xf]  ;;  %s857_s21 = scalar_lea.vmem %s4182_s8, %s2937_s16 }
  0x3d   : > { %v921_v27 = vrot.slane %v919_v24, 7  ;;  %v2966_v36 = vld [vmem:[#allocation2] sm:$0xe] }
  0x3e   : > { %v2978_v56 = vld [vmem:[#allocation2] sm:$0x8]  ;;  %s3064_s27 = smul.u32 (%p3313_p5), 40, %s4211_s25 }
  0x3f   : > { %v924_v28 = vor.u32 %v922_v25, %v921_v27  ;;  %v928_v29 = vld [vmem:[#allocation2 + $0x4] sm:$0x3]  ;;  %v998_v27 = vld [vmem:[%s869_s13] sm:$0x3] }
  0x40   : > { %s2551_s29 = sadd.s32 (%p3313_p5), %s4212_s23, %s3064_s27 }
  0x41   : > { %v929_v32 = vsel %vm927_vm13, %v924_v28, %v928_v29  ;;  %v3195_v29 = vmov 0   ;;  %s3048_s15 = sshll.u32 (%p3313_p5), %s2551_s29, 3 }
  0x42   : > { %930 = vst [vmem:[#allocation2 + $0x4] sm:$0x3] %v929_v32  ;;  %v935_v33 = vld.sshfl [vmem:[#allocation1] sm:$0xff pattern:$0x75643120]  ;;  %3129 = vset.pattern.permute.xlu1 %v3195_v29  ;;  %3128 = vset.pattern.permute.xlu0 %v3195_v29  ;;  %s4113_s17 = scalar_lea.vmem (%p3313_p5), %s4213_s19, %s3048_s15 }
  0x43   : > { %v941_v34 = vsel %vm939_vm14, %v935_v33, %v940_v30  ;;  %945 = vst [vmem:[#allocation1] ss:$2 sm:$0xff] %v943_v31  ;;  %v1023_v30 = vld [vmem:[%s4185_s11 + $0x18] sm:$0xff]  ;;  %v1022_v31 = vld [vmem:[%s4185_s11 + $0x10] sm:$0xff]  ;;  %v3196_v33 = vmov 1  }
  0x44   : > { %942 = vst [vmem:[#allocation2 + $0x4] sm:$0xc] %v941_v34  ;;  %3131 = vset.pattern.permute.xlu2 %v3196_v33  ;;  %v1020_v34 = vld [vmem:[%s4185_s11] sm:$0xff] }
  0x49   : > { %v3054_v38 = vld [vmem:[#allocation2] sm:$0x10] }
  0x4a   : > { %v3055_v39 = vld [vmem:[#allocation2] sm:$0x30]  ;;  %v3405_v40 = vor.u32 %v3054_v38, %v2950_v35  ;;  %v946_v42 = vld.sshfl [vmem:[#allocation1] sm:$0xff pattern:$0x75643120] }
  0x4b   : > { %v2967_v41 = vor.u32 %v3055_v39, %v2966_v36  ;;  %v947_v43 = vshll.u32 %v946_v42, 16  ;;  %967 = vst [vmem:[#allocation1] ss:$2 sm:$0xff] %v965_v37  ;;  %v950_v44 = vshrl.u32 %v946_v42, 16  ;;  %v960_v47 = vld [vmem:[#allocation2 + $0x4] sm:$0x8] }
  0x4c   : > { %1112 = vrot.lane.b32.xlu0 %v3405_v40, %s3192_s22  ;;  %v1087_v22 = vand.u32 %v3405_v40, %v3440_v21 }
  0x4d   : > { %v1299_v45 = vshrl.u32 %v2967_v41, 16  ;;  %v1302_v46 = vshll.u32 %v2967_v41, 16  ;;  %v949_v48 = vrot.slane %v947_v43, 5  ;;  %v952_v49 = vrot.slane %v950_v44, 4  ;;  %v1021_v44 = vld [vmem:[%s4185_s11 + $0x8] sm:$0xff] }
  0x4e   : > { %1096 = vmatpush.bf16.msra.mxu1 %v1087_v22 }
  0x4f   : > { %v1301_v50 = vrot.slane %v1299_v45, 1  ;;  %v1304_v51 = vrot.slane %v1302_v46, 2  ;;  %v961_v52 = vsel %vm959_vm0, %v949_v48, %v960_v47  ;;  %v953_v53 = vor.u32 %v952_v49, %v949_v48 }
  0x50   : > { %962 = vst [vmem:[#allocation2 + $0x4] sm:$0x8] %v961_v52 }
  0x51   : > { %v3410_v54 = vor.u32 %v1304_v51, %v1301_v50  ;;  %v954_v55 = vrot.slane %v953_v53, 4  ;;  %2954 = vmatmul.msk.bf16.vlgmr.msra.gmra.mxu1 %vm1047_vm4, %v3362_v9 }
  0x52   : > { %v968_v4 = vld.sshfl [vmem:[#allocation1] sm:$0xff pattern:$0x75643120] }
  0x53   : > { %1306 = vrot.lane.b32.xlu1 %v3410_v54, %s3193_s30  ;;  %964 = vst.msk [vmem:[#allocation2 + $0x8] sm:$0x1] %vm909_vm7, %v954_v55  ;;  %v970_v6 = vrot.slane %v968_v4, 7  ;;  %vm990_vm7 = vmand %vm937_vm11, %vm989_vm6  ;;  %v1331_v36 = vand.u32 %v3410_v54, %v3440_v21 }
  0x54   : > { %1045 = vrot.lane.b32.xlu0 %v3405_v40, %s3193_s30  ;;  %979 = vst [vmem:[#allocation1] ss:$2 sm:$0xff] %v977_v5 }
  0x55   : > { %v975_v8 = vsel %vm973_vm3, %v970_v6, %v974_v7  ;;  %1340 = vmatpush.bf16.msrb.mxu1 %v1331_v36 }
  0x56   : > { %976 = vst [vmem:[#allocation2 + $0x8] sm:$0x6] %v975_v8 }
  0x57   : > { %v3056_v57 = vld [vmem:[#allocation2] sm:$0xf0] }
  0x58   : > { %v2979_v58 = vor.u32 %v3056_v57, %v2978_v56  ;;  %v2990_v59 = vld [vmem:[#allocation2 + $0x4] sm:$0xf]  ;;  %v994_v56 = vld [vmem:[%s857_s21] sm:$0x3]  ;;  %v995_v57 = vld [vmem:[#allocation2 + $0xc] sm:$0x3] }
  0x59   : > { %v3002_v23 = vld [vmem:[#allocation2 + $0x4] sm:$0xc] }
  0x5a   : > { %v3417_v60 = vrot.slane %v2979_v58, 3  ;;  %v3057_v61 = vld [vmem:[#allocation2 + $0x4] sm:$0x10]  ;;  %v3014_v37 = vld [vmem:[#allocation2 + $0x4] sm:$0x8]  ;;  %v996_v58 = vsel %vm3339_vm2, %v994_v56, %v995_v57 }
  0x5b   : > { %v2991_v62 = vor.u32 %v3057_v61, %v2990_v59  ;;  %v980_v10 = vld.sshfl [vmem:[#allocation1] sm:$0xff pattern:$0x75643120]  ;;  %997 = vst [vmem:[#allocation2 + $0xc] sm:$0x3] %v996_v58 }
  0x5c   : > { %1352 = vrot.lane.b32.xlu0 %v3410_v54, %s3192_s22  ;;  %1527 = vrot.lane.b32.xlu2 %v3417_v60, %s3192_s22  ;;  %v981_v11 = vshrl.u32 %v980_v10, 16  ;;  %v984_v13 = vshll.u32 %v980_v10, 16  ;;  %1000 = vst [vmem:[#allocation1] ss:$2 sm:$0xff] %v998_v27  ;;  %v1506_v4 = vand.u32 %v3417_v60, %v3440_v21 }
  0x5d   : > { %v1656_v63 = vshrl.u32 %v2991_v62, 16  ;;  %v1658_v1 = vshll.u32 %v2991_v62, 16  ;;  %v991_v17 = vld [vmem:[#allocation2 + $0x8] sm:$0xc] }
  0x5e   : > { %v983_v14 = vrot.slane %v981_v11, 5  ;;  %v986_v15 = vrot.slane %v984_v13, 6  ;;  %1515 = vmatpush.bf16.msra.mxu1 %v1506_v4 }
  0x5f   : > { %v1660_v2 = vrot.slane %v1658_v1, 1 }
  0x60   : > { %v987_v16 = vor.u32 %v986_v15, %v983_v14 }
  0x61   : > { %v3423_v3 = vor.u32 %v1660_v2, %v1656_v63  ;;  %2955 = vmatmul.msk.bf16.gmra.mxu1 %vm1047_vm4, %v3390_v26 }
  0x62   : > { %v992_v18 = vsel %vm990_vm7, %v987_v16, %v991_v17  ;;  %v1010_v8 = vld [vmem:[#allocation2 + $0xc] sm:$0x6] }
  0x63   : > { %1708 = vrot.lane.b32.xlu1 %v3423_v3, %s3192_s22  ;;  %993 = vst [vmem:[#allocation2 + $0x8] sm:$0xc] %v992_v18  ;;  %v1001_v59 = vld.sshfl [vmem:[#allocation1] sm:$0xff pattern:$0x75643120]  ;;  %v1687_v15 = vand.u32 %v3423_v3, %v3440_v21 }
  0x64   : > { %1481 = vrot.lane.b32.xlu0 %v3417_v60, %s3193_s30  ;;  %1662 = vrot.lane.b32.xlu2 %v3423_v3, %s3193_s30  ;;  %v1002_v61 = vshrl.u32 %v1001_v59, 16  ;;  %v1005_v62 = vshll.u32 %v1001_v59, 16 }
  0x66   : > { %v1004_v63 = vrot.slane %v1002_v61, 6  ;;  %v1007_v1 = vrot.slane %v1005_v62, 7 }
  0x68   : > { %v1008_v0 = vor.u32 %v1007_v1, %v1004_v63 }
  0x6a   : > { %v3058_v24 = vld [vmem:[#allocation2 + $0x4] sm:$0x70]  ;;  %v1011_v10 = vsel %vm3370_vm5, %v1008_v0, %v1010_v8 }
  0x6b   : > { %v3003_v25 = vor.u32 %v3058_v24, %v3002_v23  ;;  %v3059_v38 = vld [vmem:[#allocation2 + $0x4] sm:$0xf0]  ;;  %1012 = vst [vmem:[#allocation2 + $0xc] sm:$0x6] %v1011_v10 }
  0x6c   : > { %1187 = vperm.xlu2 %3131, %v1023_v30   ;;  %v3015_v39 = vor.u32 %v3059_v38, %v3014_v37  ;;  %v3026_v60 = vld [vmem:[#allocation2 + $0x8] sm:$0xe] }
  0x6d   : > { %v3449_v28 = vrot.slane %v3003_v25, 2  ;;  %v3038_v19 = vld [vmem:[#allocation2 + $0x8] sm:$0xc] }
  0x6e   : > { %v2012_v42 = vshrl.u32 %v3015_v39, 16  ;;  %v2015_v43 = vshll.u32 %v3015_v39, 16 }
  0x6f   : > { %1837 = vrot.lane.b32.xlu1 %v3449_v28, %s3193_s30  ;;  %1883 = vrot.lane.b32.xlu0 %v3449_v28, %s3192_s22 }
  0x70   : > { %v2014_v45 = vrot.slane %v2012_v42, 3  ;;  %v2017_v46 = vrot.slane %v2015_v43, 4 }
  0x71   : > { %2970 = vmatmul.msk.bf16.vlgmr.msrb.gmra.mxu1 %vm1047_vm4, %v3362_v9 }
  0x72   : > { %v3477_v47 = vor.u32 %v2017_v46, %v2014_v45  ;;  %v3060_v11 = vld [vmem:[#allocation2 + $0x8] sm:$0x30]  ;;  %1696 = vmatpush.bf16.msrb.mxu1 %v1687_v15 }
  0x73   : > { %v3027_v13 = vor.u32 %v3060_v11, %v3026_v60  ;;  %v3061_v20 = vld [vmem:[#allocation2 + $0x8] sm:$0x70] }
  0x74   : > { %2065 = vrot.lane.b32.xlu2 %v3477_v47, %s3192_s22  ;;  %v3039_v22 = vor.u32 %v3061_v20, %v3038_v19 }
  0x75   : > { %v3518_v14 = vrot.slane %v3027_v13, 1 }
  0x76   : > { %v2369_v23 = vshrl.u32 %v3039_v22, 16  ;;  %v2372_v24 = vshll.u32 %v3039_v22, 16 }
  0x77   : > { %1163 = vperm.xlu1 %3129, %v1023_v30   ;;  %1158 = vperm.xlu0 %3128, %v1022_v31   ;;  %v2219_v8 = vand.u32 %v3518_v14, %v3440_v21 }
  0x78   : > { %v2371_v3 = vrot.slane %v2369_v23, 2  ;;  %v2374_v25 = vrot.slane %v2372_v24, 3 }
  0x7a   : > { %v3540_v27 = vor.u32 %v2374_v25, %v2371_v3 }
  0x7c   : > { %2019 = vrot.lane.b32.xlu2 %v3477_v47, %s3193_s30 }
  0x7f   : > { %3130 = vset.pattern.permute.xlu1 %v3196_v33  ;;  %1148 = vperm.xlu0 %3128, %v1020_v34  }
  0x80   : > { %1183 = vperm.xlu1 %3130, %v1022_v31  }
  0x81   : > { %v3487_v52 = vpop.permute.xlu2 %1110  ;;  %2971 = vmatmul.msk.bf16.gmra.mxu1 %vm1047_vm4, %v3390_v26 }
  0x84   : > { %1175 = vperm.xlu2 %3131, %v1020_v34  }
  0x87   : > { %3133 = vset.pattern.permute.xlu0 %v3196_v33  ;;  %v1862_v33 = vand.u32 %v3449_v28, %v3440_v21 }
  0x88   : > { %3132 = vset.pattern.permute.xlu1 %v3195_v29  ;;  %1179 = vperm.xlu0 %3133, %v1021_v44  }
  0x89   : > { %1153 = vperm.xlu1 %3132, %v1021_v44   ;;  %v3500_v55 = vpop.permute.xlu2 %1038  ;;  %v2044_v44 = vand.u32 %v3477_v47, %v3440_v21 }
  0x8c   : > { %2194 = vrot.lane.b32.xlu2 %v3518_v14, %s3193_s30 }
  0x91   : > { %2982 = vmatmul.msk.bf16.vlgmr.msra.gmra.mxu1 %vm1047_vm4, %v3362_v9  ;;  %2240 = vrot.lane.b32.xlu1 %v3518_v14, %s3192_s22 }
  0x92   : > { %1871 = vmatpush.bf16.msra.mxu1 %v1862_v33 }
  0x94   : > { %2376 = vrot.lane.b32.xlu2 %v3540_v27, %s3193_s30 }
  0x99   : > { %v3461_v32 = vpop.permute.xlu1 %1108  ;;  %2422 = vrot.lane.b32.xlu1 %v3540_v27, %s3192_s22 }
  0xa1   : > { %v3468_v35 = vpop.permute.xlu1 %1036  ;;  %2983 = vmatmul.msk.bf16.gmra.mxu1 %vm1047_vm4, %v3390_v26 }
  0xb1   : > { %2994 = vmatmul.msk.bf16.vlgmr.msrb.gmra.mxu1 %vm1047_vm4, %v3362_v9 }
  0xb2   : > { %2053 = vmatpush.bf16.msrb.mxu1 %v2044_v44 }
  0xb6   : > { %v1528_v2 = vpop.permute.xlu2 %1527 }
  0xb7   : > { %v1530_v6 = vand.u32 %v1528_v2, %v3440_v21 }
  0xbe   : > { %v1113_v40 = vpop.permute.xlu0 %1112  ;;  %v1663_v16 = vpop.permute.xlu2 %1662 }
  0xbf   : > { %v1121_v41 = vand.u32 %v1113_v40, %v3440_v21  ;;  %v1665_v18 = vand.u32 %v1663_v16, %v3440_v21 }
  0xc1   : > { %1130 = vmatpush.bf16.msra.mxu2 %v1121_v41  ;;  %2995 = vmatmul.msk.bf16.gmra.mxu1 %vm1047_vm4, %v3390_v26 }
  0xc4   : > { %2956 = vmatmul.msk.bf16.vlgmr.msra.gmra.mxu2 %vm1047_vm4, %v3461_v32 }
  0xc5   : > { %v1307_v48 = vpop.permute.xlu1 %1306 }
  0xc6   : > { %v1046_v49 = vpop.permute.xlu0 %1045  ;;  %v1309_v50 = vand.u32 %v1307_v48, %v3440_v21  ;;  %v3552_v29 = vpop.permute.xlu2 %1187 }
  0xc7   : > { %v1059_v51 = vand.u32 %v3440_v21, %v1046_v49 }
  0xc9   : > { %1068 = vmatpush.bf16.msra.mxu0 %v1059_v51 }
  0xcc   : > { %2952 = vmatmul.msk.bf16.vlgmr.msra.gmra.mxu0 %vm1047_vm4, %v3468_v35 }
  0xcd   : > { %1318 = vmatpush.bf16.msrb.mxu0 %v1309_v50 }
  0xce   : > { %v1353_v53 = vpop.permute.xlu0 %1352  ;;  %v2066_v37 = vpop.permute.xlu2 %2065 }
  0xcf   : > { %v1355_v54 = vand.u32 %v1353_v53, %v3440_v21  ;;  %v2068_v38 = vand.u32 %v2066_v37, %v3440_v21  ;;  %v1098_v39 = vpop.f32.mrf.mxu1 }
  0xd1   : > { %1364 = vmatpush.bf16.msrb.mxu2 %v1355_v54  ;;  %3006 = vmatmul.msk.bf16.vlgmr.msra.gmra.mxu1 %vm1047_vm4, %v3362_v9 }
  0xd2   : > { %2228 = vmatpush.bf16.msra.mxu1 %v2219_v8 }
  0xd4   : > { %2957 = vmatmul.msk.bf16.gmra.mxu2 %vm1047_vm4, %v3487_v52 }
  0xd5   : > { %1539 = vmatpush.bf16.msra.mxu2 %v1530_v6  ;;  %v1709_v12 = vpop.permute.xlu1 %1708 }
  0xd6   : > { %v1482_v5 = vpop.permute.xlu0 %1481  ;;  %v1711_v17 = vand.u32 %v1709_v12, %v3440_v21  ;;  %v2020_v40 = vpop.permute.xlu2 %2019 }
  0xd7   : > { %v1484_v7 = vand.u32 %v1482_v5, %v3440_v21  ;;  %v2022_v28 = vand.u32 %v2020_v40, %v3440_v21  ;;  %v1100_v41 = vpop.f32.mrf.mxu1 }
  0xd9   : > { %1493 = vmatpush.bf16.msra.mxu0 %v1484_v7 }
  0xdc   : > { %2953 = vmatmul.msk.bf16.gmra.mxu0 %vm1047_vm4, %v3500_v55 }
  0xde   : > { %v3606_v4 = vpop.permute.xlu2 %1175 }
  0xdf   : > { %v1103_v42 = vpop.f32.mrf.mxu1 }
  0xe1   : > { %v1838_v30 = vpop.permute.xlu1 %1837  ;;  %v1884_v31 = vpop.permute.xlu0 %1883  ;;  %3007 = vmatmul.msk.bf16.gmra.mxu1 %vm1047_vm4, %v3390_v26 }
  0xe2   : > { %v1840_v34 = vand.u32 %v1838_v30, %v3440_v21  ;;  %v1886_v36 = vand.u32 %v1884_v31, %v3440_v21 }
  0xe4   : > { %2972 = vmatmul.msk.bf16.vlgmr.msrb.gmra.mxu2 %vm1047_vm4, %v3461_v32 }
  0xe5   : > { %1720 = vmatpush.bf16.msrb.mxu2 %v1711_v17 }
  0xe6   : > { %v2195_v22 = vpop.permute.xlu2 %2194 }
  0xe7   : > { %v1105_v43 = vpop.f32.mrf.mxu1  ;;  %v2197_v24 = vand.u32 %v2195_v22, %v3440_v21 }
  0xe9   : > { %v3578_v46 = vpop.permute.xlu1 %1163  ;;  %v3592_v56 = vpop.permute.xlu0 %1158 }
  0xec   : > { %2968 = vmatmul.msk.bf16.vlgmr.msrb.gmra.mxu0 %vm1047_vm4, %v3468_v35 }
  0xed   : > { %1674 = vmatpush.bf16.msrb.mxu0 %v1665_v18 }
  0xef   : > { %v3576_v45 = vpop.f32.mrf.mxu1 }
  0xf1   : > { %3018 = vmatmul.msk.bf16.vlgmr.msrb.gmra.mxu1 %vm1047_vm4, %v3362_v9  ;;  %v3604_v1 = vpop.permute.xlu0 %1148 }
  0xf2   : > { %v3588_v51 = vpop.permute.xlu1 %1183 }
  0xf4   : > { %2973 = vmatmul.msk.bf16.gmra.mxu2 %vm1047_vm4, %v3487_v52 }
  0xf7   : > { %v3584_v50 = vpop.f32.mrf.mxu1 }
  0xfa   : > { %v3619_v14 = vpop.permute.xlu0 %1179 }
  0xfb   : > { %v3598_v57 = vpop.permute.xlu1 %1153 }
  0xfc   : > { %2969 = vmatmul.msk.bf16.gmra.mxu0 %vm1047_vm4, %v3500_v55 }
  0xff   : > { %v3590_v54 = vpop.f32.mrf.mxu1 }
 0x101   : > { %3019 = vmatmul.msk.bf16.gmra.mxu1 %vm1047_vm4, %v3390_v26 }
 0x103   : > { %v2241_v6 = vpop.permute.xlu1 %2240 }
 0x104   : > { %2984 = vmatmul.msk.bf16.vlgmr.msra.gmra.mxu2 %vm1047_vm4, %v3461_v32  ;;  %v2243_v0 = vand.u32 %v2241_v6, %v3440_v21 }
 0x105   : > { %1895 = vmatpush.bf16.msra.mxu2 %v1886_v36 }
 0x107   : > { %v3600_v61 = vpop.f32.mrf.mxu1 }
 0x10c   : > { %2980 = vmatmul.msk.bf16.vlgmr.msra.gmra.mxu0 %vm1047_vm4, %v3468_v35 }
 0x10d   : > { %1849 = vmatpush.bf16.msra.mxu0 %v1840_v34 }
 0x10f   : > { %v3611_v11 = vpop.f32.mrf.mxu1 }
 0x111   : > { %3030 = vmatmul.msk.bf16.vlgmr.msra.gmra.mxu1 %vm1047_vm4, %v3362_v9 }
 0x114   : > { %2985 = vmatmul.msk.bf16.gmra.mxu2 %vm1047_vm4, %v3487_v52 }
 0x117   : > { %v3627_v31 = vpop.f32.mrf.mxu1 }
 0x11c   : > { %2981 = vmatmul.msk.bf16.gmra.mxu0 %vm1047_vm4, %v3500_v55 }
 0x121   : > { %3031 = vmatmul.msk.bf16.gmra.mxu1 %vm1047_vm4, %v3390_v26 }
 0x124   : > { %2996 = vmatmul.msk.bf16.vlgmr.msrb.gmra.mxu2 %vm1047_vm4, %v3461_v32 }
 0x125   : > { %2077 = vmatpush.bf16.msrb.mxu2 %v2068_v38 }
 0x12c   : > { %2992 = vmatmul.msk.bf16.vlgmr.msrb.gmra.mxu0 %vm1047_vm4, %v3468_v35 }
 0x12d   : > { %2031 = vmatpush.bf16.msrb.mxu0 %v2022_v28 }
 0x134   : > { %2997 = vmatmul.msk.bf16.gmra.mxu2 %vm1047_vm4, %v3487_v52 }
 0x13c   : > { %2993 = vmatmul.msk.bf16.gmra.mxu0 %vm1047_vm4, %v3500_v55 }
 0x144   : > { %3008 = vmatmul.msk.bf16.vlgmr.msra.gmra.mxu2 %vm1047_vm4, %v3461_v32 }
 0x145   : > { %2252 = vmatpush.bf16.msra.mxu2 %v2243_v0 }
 0x147   : > { %v1132_v48 = vpop.f32.mrf.mxu2 }
 0x149   : > { %v1070_v49 = vpop.f32.mrf.mxu0 }
 0x14a   : > { %v1099_v2 = vadd.f32 %v1098_v39, %v1070_v49  ;;  %v1019_v49 = vld [vmem:[%s4186_s12 + $0x8] sm:$0x3] }
 0x14c   : > { %3004 = vmatmul.msk.bf16.vlgmr.msra.gmra.mxu0 %vm1047_vm4, %v3468_v35  ;;  %v1142_v13 = vadd.f32 %v1132_v48, %v1099_v2  ;;  %v2423_v2 = vpop.permute.xlu1 %2422 }
 0x14d   : > { %2206 = vmatpush.bf16.msra.mxu0 %v2197_v24  ;;  %v2425_v6 = vand.u32 %v2423_v2, %v3440_v21 }
 0x14e   : > { %v1166_v20 = vadd.f32 %v3604_v1, %v1142_v13 }
 0x14f   : > { %v1134_v47 = vpop.f32.mrf.mxu2 }
 0x150   : > { %v1190_v36 = vmul.f32 %v3606_v4, %v1166_v20  ;;  %vm1170_vm11 = vcmp.gt.f32.partialorder %v1166_v20, 0.0 }
 0x151   : > { %v1072_v53 = vpop.f32.mrf.mxu0 }
 0x152   : > { %v1101_v63 = vadd.f32 %v1100_v41, %v1072_v53  ;;  %v1194_v39 = vsel %vm1170_vm11, %v1166_v20, %v1190_v36  ;;  %v3635_v41 = vld [vmem:[%s4186_s12] sm:$0xff] }
 0x154   : > { %3009 = vmatmul.msk.bf16.gmra.mxu2 %vm1047_vm4, %v3487_v52  ;;  %v1143_v10 = vadd.f32 %v1134_v47, %v1101_v63 }
 0x156   : > { %v1167_v17 = vadd.f32 %v3598_v57, %v1143_v10 }
 0x157   : > { %v1137_v58 = vpop.f32.mrf.mxu2 }
 0x158   : > { %v1191_v25 = vmul.f32 %v3619_v14, %v1167_v17  ;;  %vm1171_vm10 = vcmp.gt.f32.partialorder %v1167_v17, 0.0 }
 0x159   : > { %v1075_v59 = vpop.f32.mrf.mxu0 }
 0x15a   : > { %v1104_v62 = vadd.f32 %v1103_v42, %v1075_v59  ;;  %v1195_v38 = vsel %vm1171_vm10, %v1167_v17, %v1191_v25  ;;  %v1205_v59 = vunpack.c.l.b16 %v1019_v49 }
 0x15b   : > { %v1198_v28 = vpack.c.bf16 %v1195_v38, %v1194_v39 }
 0x15c   : > { %3005 = vmatmul.msk.bf16.gmra.mxu0 %vm1047_vm4, %v3500_v55  ;;  %v1144_v5 = vadd.f32 %v1137_v58, %v1104_v62  ;;  %v3658_v8 = vpack.c.b16 %v1205_v59, %v1205_v59 }
 0x15e   : > { %v1168_v12 = vadd.f32 %v3592_v56, %v1144_v5 }
 0x15f   : > { %v1139_v7 = vpop.f32.mrf.mxu2 }
 0x160   : > { %v1192_v19 = vmul.f32 %v3588_v51, %v1168_v12  ;;  %vm1172_vm2 = vcmp.gt.f32.partialorder %v1168_v12, 0.0 }
 0x161   : > { %v1077_v60 = vpop.f32.mrf.mxu0 }
 0x162   : > { %v1106_v15 = vadd.f32 %v1105_v43, %v1077_v60  ;;  %v1196_v33 = vsel %vm1172_vm2, %v1168_v12, %v1192_v19  ;;  %v3637_v43 = vpop.f32.mrf.mxu1 }
 0x164   : > { %v1145_v16 = vadd.f32 %v1139_v7, %v1106_v15  ;;  %3020 = vmatmul.msk.bf16.vlgmr.msrb.gmra.mxu2 %vm1047_vm4, %v3461_v32  ;;  %v2401_v7 = vand.u32 %v3540_v27, %v3440_v21 }
 0x165   : > { %2434 = vmatpush.bf16.msrb.mxu2 %v2425_v6 }
 0x166   : > { %v1169_v18 = vadd.f32 %v3578_v46, %v1145_v16  ;;  %2410 = vmatpush.bf16.msrb.mxu1 %v2401_v7  ;;  %v2377_v16 = vpop.permute.xlu2 %2376 }
 0x167   : > { %v1366_v23 = vpop.f32.mrf.mxu2 }
 0x168   : > { %vm1173_vm5 = vcmp.gt.f32.partialorder %v1169_v18, 0.0  ;;  %v1193_v3 = vmul.f32 %v3552_v29, %v1169_v18 }
 0x169   : > { %v1320_v30 = vpop.f32.mrf.mxu0  ;;  %3042 = vmatmul.msk.bf16.vlgmr.msrb.gmra.mxu1 %vm1047_vm4, %v3362_v9 }
 0x16a   : > { %v1197_v34 = vsel %vm1173_vm5, %v1169_v18, %v1193_v3  ;;  %v3648_v47 = vpop.f32.mrf.mxu1  ;;  %v1343_v62 = vadd.f32 %v3576_v45, %v1320_v30  ;;  %v2379_v18 = vand.u32 %v2377_v16, %v3440_v21 }
 0x16b   : > { %v1199_v37 = vpack.c.bf16 %v1197_v34, %v1196_v33 }
 0x16c   : > { %3016 = vmatmul.msk.bf16.vlgmr.msrb.gmra.mxu0 %vm1047_vm4, %v3468_v35 }
 0x16d   : > { %1221 = vmatpush.bf16.msra.mxu3 %v1199_v37  ;;  %2388 = vmatpush.bf16.msrb.mxu0 %v2379_v18 }
 0x16f   : > { %v1368_v40 = vpop.f32.mrf.mxu2 }
 0x171   : > { %1222 = vmatpush.bf16.msra.mxu3 %v1198_v28  ;;  %v1322_v42 = vpop.f32.mrf.mxu0 }
 0x172   : > { %v1345_v58 = vadd.f32 %v3584_v50, %v1322_v42  ;;  %v1376_v50 = vadd.f32 %v1366_v23, %v1343_v62  ;;  %v3662_v45 = vpop.f32.mrf.mxu1 }
 0x174   : > { %3021 = vmatmul.msk.bf16.gmra.mxu2 %vm1047_vm4, %v3487_v52  ;;  %2962 = vmatmul.msk.bf16.vlgmr.msra.gmra.mxu3 %vm1208_vm12, %v3635_v41  ;;  %v1377_v0 = vadd.f32 %v1368_v40, %v1345_v58  ;;  %v1380_v27 = vadd.f32 %v1376_v50, %v3604_v1 }
 0x176   : > { %v1381_v13 = vadd.f32 %v1377_v0, %v3598_v57  ;;  %v1388_v24 = vmul.f32 %v1380_v27, %v3606_v4  ;;  %vm1384_vm0 = vcmp.gt.f32.partialorder %v1380_v27, 0.0 }
 0x177   : > { %v1371_v44 = vpop.f32.mrf.mxu2 }
 0x178   : > { %v1389_v20 = vmul.f32 %v1381_v13, %v3619_v14  ;;  %vm1385_vm15 = vcmp.gt.f32.partialorder %v1381_v13, 0.0  ;;  %v1392_v21 = vsel %vm1384_vm0, %v1380_v27, %v1388_v24 }
 0x179   : > { %v1325_v48 = vpop.f32.mrf.mxu0  ;;  %3043 = vmatmul.msk.bf16.gmra.mxu1 %vm1047_vm4, %v3390_v26 }
 0x17a   : > { %v1348_v53 = vadd.f32 %v3590_v54, %v1325_v48  ;;  %v1393_v25 = vsel %vm1385_vm15, %v1381_v13, %v1389_v20  ;;  %v1700_v30 = vpop.f32.mrf.mxu1 }
 0x17b   : > { %v1396_v34 = vpack.c.bf16 %v1393_v25, %v1392_v21 }
 0x17c   : > { %3017 = vmatmul.msk.bf16.gmra.mxu0 %vm1047_vm4, %v3500_v55  ;;  %v1378_v63 = vadd.f32 %v1371_v44, %v1348_v53 }
 0x17e   : > { %v1382_v10 = vadd.f32 %v1378_v63, %v3592_v56 }
 0x17f   : > { %v1373_v5 = vpop.f32.mrf.mxu2 }
 0x180   : > { %vm1386_vm13 = vcmp.gt.f32.partialorder %v1382_v10, 0.0 }
 0x181   : > { %v1327_v54 = vpop.f32.mrf.mxu0 }
 0x182   : > { %v1350_v60 = vadd.f32 %v3600_v61, %v1327_v54  ;;  %v1390_v61 = vmul.f32 %v1382_v10, %v3588_v51  ;;  %v1703_v37 = vpop.f32.mrf.mxu1 }
 0x184   : > { %v1379_v12 = vadd.f32 %v1373_v5, %v1350_v60  ;;  %3032 = vmatmul.msk.bf16.vlgmr.msra.gmra.mxu2 %vm1047_vm4, %v3461_v32  ;;  %2963 = vmatmul.msk.bf16.gmra.mxu3 %vm1208_vm12, %v3658_v8  ;;  %v1394_v9 = vsel %vm1386_vm13, %v1382_v10, %v1390_v61 }
 0x186   : > { %v1383_v15 = vadd.f32 %v1379_v12, %v3578_v46 }
 0x187   : > { %v1541_v17 = vpop.f32.mrf.mxu2 }
 0x188   : > { %vm1387_vm14 = vcmp.gt.f32.partialorder %v1383_v15, 0.0  ;;  %v1391_v19 = vmul.f32 %v1383_v15, %v3552_v29 }
 0x189   : > { %v1495_v22 = vpop.f32.mrf.mxu0 }
 0x18a   : > { %v1395_v23 = vsel %vm1387_vm14, %v1383_v15, %v1391_v19  ;;  %v1518_v42 = vadd.f32 %v3611_v11, %v1495_v22  ;;  %v1705_v53 = vpop.f32.mrf.mxu1  ;;  %vm1270_vm14 = vcmask 122880  }
 0x18b   : > { %v1397_v3 = vpack.c.bf16 %v1395_v23, %v1394_v9 }
 0x18c   : > { %3028 = vmatmul.msk.bf16.vlgmr.msra.gmra.mxu0 %vm1047_vm4, %v3468_v35  ;;  %v1551_v59 = vadd.f32 %v1541_v17, %v1518_v42 }
 0x18d   : > { %1404 = vmatpush.bf16.msrb.mxu3 %v1397_v3 }
 0x18e   : > { %v1555_v11 = vadd.f32 %v1551_v59, %v3604_v1 }
 0x18f   : > { %v1543_v33 = vpop.f32.mrf.mxu2 }
 0x190   : > { %vm1559_vm7 = vcmp.gt.f32.partialorder %v1555_v11, 0.0 }
 0x191   : > { %1405 = vmatpush.bf16.msrb.mxu3 %v1396_v34  ;;  %v1497_v36 = vpop.f32.mrf.mxu0 }
 0x192   : > { %v1520_v28 = vadd.f32 %v3627_v31, %v1497_v36  ;;  %v1873_v50 = vpop.f32.mrf.mxu1 }
 0x194   : > { %3033 = vmatmul.msk.bf16.gmra.mxu2 %vm1047_vm4, %v3487_v52  ;;  %2974 = vmatmul.msk.bf16.vlgmr.msrb.gmra.mxu3 %vm1208_vm12, %v3635_v41  ;;  %v1552_v49 = vadd.f32 %v1543_v33, %v1520_v28 }
 0x196   : > { %v1556_v63 = vadd.f32 %v1552_v49, %v3598_v57 }
 0x197   : > { %v1546_v38 = vpop.f32.mrf.mxu2 }
 0x198   : > { %v1564_v6 = vmul.f32 %v1556_v63, %v3619_v14  ;;  %vm1560_vm6 = vcmp.gt.f32.partialorder %v1556_v63, 0.0 }
 0x199   : > { %v1500_v39 = vpop.f32.mrf.mxu0 }
 0x19a   : > { %v1523_v40 = vadd.f32 %v3637_v43, %v1500_v39  ;;  %v1568_v60 = vsel %vm1560_vm6, %v1556_v63, %v1564_v6  ;;  %v1875_v61 = vpop.f32.mrf.mxu1 }
 0x19c   : > { %3029 = vmatmul.msk.bf16.gmra.mxu0 %vm1047_vm4, %v3500_v55  ;;  %v1553_v44 = vadd.f32 %v1546_v38, %v1523_v40 }
 0x19e   : > { %v1557_v26 = vadd.f32 %v1553_v44, %v3592_v56 }
 0x19f   : > { %v1548_v48 = vpop.f32.mrf.mxu2 }
 0x1a0   : > { %v1565_v31 = vmul.f32 %v1557_v26, %v3588_v51  ;;  %vm1561_vm1 = vcmp.gt.f32.partialorder %v1557_v26, 0.0 }
 0x1a1   : > { %v1502_v58 = vpop.f32.mrf.mxu0 }
 0x1a2   : > { %v1525_v62 = vadd.f32 %v3648_v47, %v1502_v58  ;;  %v1569_v0 = vsel %vm1561_vm1, %v1557_v26, %v1565_v31  ;;  %v1878_v22 = vpop.f32.mrf.mxu1 }
 0x1a4   : > { %v1554_v43 = vadd.f32 %v1548_v48, %v1525_v62  ;;  %3044 = vmatmul.msk.bf16.vlgmr.msrb.gmra.mxu2 %vm1047_vm4, %v3461_v32  ;;  %2975 = vmatmul.msk.bf16.gmra.mxu3 %vm1208_vm12, %v3658_v8  ;;  %v1563_v32 = vmul.f32 %v1555_v11, %v3606_v4 }
 0x1a6   : > { %v1558_v2 = vadd.f32 %v1554_v43, %v3578_v46  ;;  %v1567_v13 = vsel %vm1559_vm7, %v1555_v11, %v1563_v32 }
 0x1a7   : > { %v1722_v5 = vpop.f32.mrf.mxu2  ;;  %v1571_v27 = vpack.c.bf16 %v1568_v60, %v1567_v13 }
 0x1a8   : > { %vm1562_vm3 = vcmp.gt.f32.partialorder %v1558_v2, 0.0  ;;  %v1566_v47 = vmul.f32 %v1558_v2, %v3552_v29 }
 0x1a9   : > { %v1676_v7 = vpop.f32.mrf.mxu0 }
 0x1aa   : > { %v1570_v54 = vsel %vm1562_vm3, %v1558_v2, %v1566_v47  ;;  %v1880_v38 = vpop.f32.mrf.mxu1 }
 0x1ab   : > { %v1572_v10 = vpack.c.bf16 %v1570_v54, %v1569_v0 }
 0x1ac   : > { %3040 = vmatmul.msk.bf16.vlgmr.msrb.gmra.mxu0 %vm1047_vm4, %v3468_v35  ;;  %v1699_v35 = vadd.f32 %v3662_v45, %v1676_v7 }
 0x1ad   : > { %1579 = vmatpush.bf16.msra.mxu3 %v1572_v10 }
 0x1ae   : > { %v1732_v3 = vadd.f32 %v1722_v5, %v1699_v35 }
 0x1af   : > { %v1724_v12 = vpop.f32.mrf.mxu2 }
 0x1b1   : > { %1580 = vmatpush.bf16.msra.mxu3 %v1571_v27  ;;  %v1678_v15 = vpop.f32.mrf.mxu0 }
 0x1b2   : > { %v1701_v19 = vadd.f32 %v1700_v30, %v1678_v15  ;;  %v1736_v30 = vadd.f32 %v1732_v3, %v3604_v1  ;;  %v3723_v26 = vpop.f32.mrf.mxu1 }
 0x1b4   : > { %3045 = vmatmul.msk.bf16.gmra.mxu2 %vm1047_vm4, %v3487_v52  ;;  %2986 = vmatmul.msk.bf16.vlgmr.msra.gmra.mxu3 %vm1208_vm12, %v3635_v41  ;;  %v1733_v23 = vadd.f32 %v1724_v12, %v1701_v19  ;;  %v1744_v40 = vmul.f32 %v1736_v30, %v3606_v4  ;;  %vm1740_vm2 = vcmp.gt.f32.partialorder %v1736_v30, 0.0 }
 0x1b6   : > { %v1737_v21 = vadd.f32 %v1733_v23, %v3598_v57  ;;  %v1748_v49 = vsel %vm1740_vm2, %v1736_v30, %v1744_v40 }
 0x1b7   : > { %v1727_v16 = vpop.f32.mrf.mxu2 }
 0x1b8   : > { %v1745_v36 = vmul.f32 %v1737_v21, %v3619_v14 }
 0x1b9   : > { %v1681_v17 = vpop.f32.mrf.mxu0 }
 0x1ba   : > { %v1704_v18 = vadd.f32 %v1703_v37, %v1681_v17  ;;  %v2057_v31 = vpop.f32.mrf.mxu1 }
 0x1bc   : > { %3041 = vmatmul.msk.bf16.gmra.mxu0 %vm1047_vm4, %v3500_v55  ;;  %v1734_v20 = vadd.f32 %v1727_v16, %v1704_v18  ;;  %vm1741_vm4 = vcmp.gt.f32.partialorder %v1737_v21, 0.0 }
 0x1bd   : > { %v1749_v48 = vsel %vm1741_vm4, %v1737_v21, %v1745_v36 }
 0x1be   : > { %v1738_v52 = vadd.f32 %v1734_v20, %v3592_v56  ;;  %v1752_v58 = vpack.c.bf16 %v1749_v48, %v1748_v49 }
 0x1bf   : > { %v1729_v9 = vpop.f32.mrf.mxu2 }
 0x1c0   : > { %v1746_v55 = vmul.f32 %v1738_v52, %v3588_v51  ;;  %vm1742_vm8 = vcmp.gt.f32.partialorder %v1738_v52, 0.0 }
 0x1c1   : > { %v1683_v24 = vpop.f32.mrf.mxu0 }
 0x1c2   : > { %v1706_v25 = vadd.f32 %v1705_v53, %v1683_v24  ;;  %v1750_v28 = vsel %vm1742_vm8, %v1738_v52, %v1746_v55  ;;  %v2060_v27 = vpop.f32.mrf.mxu1 }
 0x1c4   : > { %v1735_v33 = vadd.f32 %v1729_v9, %v1706_v25  ;;  %2987 = vmatmul.msk.bf16.gmra.mxu3 %vm1208_vm12, %v3658_v8 }
 0x1c6   : > { %v1739_v45 = vadd.f32 %v1735_v33, %v3578_v46 }
 0x1c7   : > { %v1897_v34 = vpop.f32.mrf.mxu2 }
 0x1c8   : > { %vm1743_vm9 = vcmp.gt.f32.partialorder %v1739_v45, 0.0  ;;  %v1747_v37 = vmul.f32 %v1739_v45, %v3552_v29 }
 0x1c9   : > { %v1851_v39 = vpop.f32.mrf.mxu0 }
 0x1ca   : > { %v1751_v42 = vsel %vm1743_vm9, %v1739_v45, %v1747_v37  ;;  %v1874_v2 = vadd.f32 %v1873_v50, %v1851_v39  ;;  %v2062_v3 = vpop.f32.mrf.mxu1 }
 0x1cb   : > { %v1753_v44 = vpack.c.bf16 %v1751_v42, %v1750_v28 }
 0x1cc   : > { %v1907_v32 = vadd.f32 %v1897_v34, %v1874_v2 }
 0x1cd   : > { %1760 = vmatpush.bf16.msrb.mxu3 %v1753_v44 }
 0x1ce   : > { %v1911_v13 = vadd.f32 %v1907_v32, %v3604_v1 }
 0x1cf   : > { %v1899_v53 = vpop.f32.mrf.mxu2 }
 0x1d0   : > { %v1919_v18 = vmul.f32 %v1911_v13, %v3606_v4  ;;  %vm1915_vm13 = vcmp.gt.f32.partialorder %v1911_v13, 0.0 }
 0x1d1   : > { %1761 = vmatpush.bf16.msrb.mxu3 %v1752_v58  ;;  %v1853_v59 = vpop.f32.mrf.mxu0 }
 0x1d2   : > { %v1876_v11 = vadd.f32 %v1875_v61, %v1853_v59  ;;  %v1923_v9 = vsel %vm1915_vm13, %v1911_v13, %v1919_v18  ;;  %v3744_v37 = vpop.f32.mrf.mxu1 }
 0x1d4   : > { %2998 = vmatmul.msk.bf16.vlgmr.msrb.gmra.mxu3 %vm1208_vm12, %v3635_v41  ;;  %v1908_v47 = vadd.f32 %v1899_v53, %v1876_v11 }
 0x1d6   : > { %v1912_v10 = vadd.f32 %v1908_v47, %v3598_v57 }
 0x1d7   : > { %v1902_v62 = vpop.f32.mrf.mxu2 }
 0x1d8   : > { %v1920_v61 = vmul.f32 %v1912_v10, %v3619_v14  ;;  %vm1916_vm11 = vcmp.gt.f32.partialorder %v1912_v10, 0.0 }
 0x1d9   : > { %v1856_v63 = vpop.f32.mrf.mxu0 }
 0x1da   : > { %v1879_v43 = vadd.f32 %v1878_v22, %v1856_v63  ;;  %v1924_v22 = vsel %vm1916_vm11, %v1912_v10, %v1920_v61 }
 0x1db   : > { %v1927_v24 = vpack.c.bf16 %v1924_v22, %v1923_v9 }
 0x1dc   : > { %v1909_v5 = vadd.f32 %v1902_v62, %v1879_v43 }
 0x1de   : > { %v1913_v0 = vadd.f32 %v1909_v5, %v3592_v56 }
 0x1df   : > { %v1904_v6 = vpop.f32.mrf.mxu2 }
 0x1e0   : > { %v1921_v12 = vmul.f32 %v1913_v0, %v3588_v51  ;;  %vm1917_vm5 = vcmp.gt.f32.partialorder %v1913_v0, 0.0 }
 0x1e1   : > { %v1858_v7 = vpop.f32.mrf.mxu0 }
 0x1e2   : > { %v1881_v54 = vadd.f32 %v1880_v38, %v1858_v7  ;;  %v1925_v19 = vsel %vm1917_vm5, %v1913_v0, %v1921_v12  ;;  %v2232_v7 = vpop.f32.mrf.mxu1 }
 0x1e4   : > { %v1910_v60 = vadd.f32 %v1904_v6, %v1881_v54  ;;  %2999 = vmatmul.msk.bf16.gmra.mxu3 %vm1208_vm12, %v3658_v8 }
 0x1e6   : > { %v1914_v50 = vadd.f32 %v1910_v60, %v3578_v46 }
 0x1e7   : > { %v2079_v15 = vpop.f32.mrf.mxu2 }
 0x1e8   : > { %vm1918_vm10 = vcmp.gt.f32.partialorder %v1914_v50, 0.0  ;;  %v1922_v16 = vmul.f32 %v1914_v50, %v3552_v29 }
 0x1e9   : > { %v2033_v17 = vpop.f32.mrf.mxu0 }
 0x1ea   : > { %v1926_v35 = vsel %vm1918_vm10, %v1914_v50, %v1922_v16  ;;  %v2056_v42 = vadd.f32 %v3723_v26, %v2033_v17  ;;  %v2235_v9 = vpop.f32.mrf.mxu1 }
 0x1eb   : > { %v1928_v20 = vpack.c.bf16 %v1926_v35, %v1925_v19 }
 0x1ec   : > { %v2089_v26 = vadd.f32 %v2079_v15, %v2056_v42 }
 0x1ed   : > { %1935 = vmatpush.bf16.msra.mxu3 %v1928_v20 }
 0x1ee   : > { %v2093_v0 = vadd.f32 %v2089_v26, %v3604_v1 }
 0x1ef   : > { %v2081_v23 = vpop.f32.mrf.mxu2 }
 0x1f0   : > { %v2101_v17 = vmul.f32 %v2093_v0, %v3606_v4  ;;  %vm2097_vm3 = vcmp.gt.f32.partialorder %v2093_v0, 0.0 }
 0x1f1   : > { %1936 = vmatpush.bf16.msra.mxu3 %v1927_v24  ;;  %v2035_v52 = vpop.f32.mrf.mxu0 }
 0x1f2   : > { %v2058_v39 = vadd.f32 %v2057_v31, %v2035_v52  ;;  %v2105_v22 = vsel %vm2097_vm3, %v2093_v0, %v2101_v17 }
 0x1f4   : > { %3010 = vmatmul.msk.bf16.vlgmr.msra.gmra.mxu3 %vm1208_vm12, %v3635_v41  ;;  %v2090_v48 = vadd.f32 %v2081_v23, %v2058_v39 }
 0x1f6   : > { %v2094_v5 = vadd.f32 %v2090_v48, %v3598_v57 }
 0x1f7   : > { %v2084_v25 = vpop.f32.mrf.mxu2  ;;  %v1224_v21 = vpop.f32.mrf.mxu3 }
 0x1f8   : > { %v1236_v33 = vrot.slane %v1224_v21, 1  ;;  %v1237_v30 = vrot.slane %v1224_v21, 2  ;;  %v1238_v55 = vrot.slane %v1224_v21, 3  ;;  %1271 = vst.msk [vmem:[%s3740_s18] sm:$0x1] %vm1270_vm14, %v1224_v21  ;;  %v1239_v34 = vrot.slane %v1224_v21, 4 }
 0x1f9   : > { %v2038_v45 = vpop.f32.mrf.mxu0  ;;  %v1240_v38 = vrot.slane %v1224_v21, 5  ;;  %v1241_v40 = vrot.slane %v1224_v21, 6  ;;  %v1242_v28 = vrot.slane %v1224_v21, 7  ;;  %v2102_v60 = vmul.f32 %v2094_v5, %v3619_v14 }
 0x1fa   : > { %v2061_v36 = vadd.f32 %v2060_v27, %v2038_v45  ;;  %1272 = vst.msk [vmem:[%s3740_s18 + $0x8] sm:$0x1] %vm1270_vm14, %v1236_v33  ;;  %vm2098_vm1 = vcmp.gt.f32.partialorder %v2094_v5, 0.0 }
 0x1fb   : > { %1273 = vst.msk [vmem:[%s3740_s18 + $0x10] sm:$0x1] %vm1270_vm14, %v1237_v30  ;;  %v2106_v20 = vsel %vm2098_vm1, %v2094_v5, %v2102_v60 }
 0x1fc   : > { %1274 = vst.msk [vmem:[%s3740_s18 + $0x18] sm:$0x1] %vm1270_vm14, %v1238_v55  ;;  %v2091_v44 = vadd.f32 %v2084_v25, %v2061_v36  ;;  %v2109_v24 = vpack.c.bf16 %v2106_v20, %v2105_v22 }
 0x1fd   : > { %1275 = vst.msk [vmem:[%s3740_s18 + $0x20] sm:$0x1] %vm1270_vm14, %v1239_v34  ;;  %v2237_v34 = vpop.f32.mrf.mxu1 }
 0x1fe   : > { %1276 = vst.msk [vmem:[%s3740_s18 + $0x28] sm:$0x1] %vm1270_vm14, %v1240_v38  ;;  %v2095_v11 = vadd.f32 %v2091_v44, %v3592_v56 }
 0x1ff   : > { %v2086_v49 = vpop.f32.mrf.mxu2  ;;  %1277 = vst.msk [vmem:[%s3740_s18 + $0x30] sm:$0x1] %vm1270_vm14, %v1241_v40  ;;  %v1226_v53 = vpop.f32.mrf.mxu3 }
 0x200   : > { %1278 = vst.msk [vmem:[%s3740_s18 + $0x38] sm:$0x1] %vm1270_vm14, %v1242_v28  ;;  %v1243_v58 = vrot.slane %v1226_v53, 1  ;;  %v1244_v59 = vrot.slane %v1226_v53, 2  ;;  %v1245_v63 = vrot.slane %v1226_v53, 3  ;;  %v1246_v43 = vrot.slane %v1226_v53, 4 }
 0x201   : > { %v2040_v62 = vpop.f32.mrf.mxu0  ;;  %1279 = vst.msk [vmem:[%s3740_s18 + $0x40] sm:$0x1] %vm1270_vm14, %v1226_v53  ;;  %v1247_v2 = vrot.slane %v1226_v53, 5  ;;  %v1248_v6 = vrot.slane %v1226_v53, 6  ;;  %v1249_v32 = vrot.slane %v1226_v53, 7  ;;  %v2103_v54 = vmul.f32 %v2095_v11, %v3588_v51 }
 0x202   : > { %v2063_v31 = vadd.f32 %v2062_v3, %v2040_v62  ;;  %1280 = vst.msk [vmem:[%s3740_s18 + $0x48] sm:$0x1] %vm1270_vm14, %v1243_v58  ;;  %vm2099_vm15 = vcmp.gt.f32.partialorder %v2095_v11, 0.0 }
 0x203   : > { %1281 = vst.msk [vmem:[%s3740_s18 + $0x50] sm:$0x1] %vm1270_vm14, %v1244_v59  ;;  %v2107_v18 = vsel %vm2099_vm15, %v2095_v11, %v2103_v54 }
 0x204   : > { %v2092_v47 = vadd.f32 %v2086_v49, %v2063_v31  ;;  %1282 = vst.msk [vmem:[%s3740_s18 + $0x58] sm:$0x1] %vm1270_vm14, %v1245_v63  ;;  %3011 = vmatmul.msk.bf16.gmra.mxu3 %vm1208_vm12, %v3658_v8 }
 0x205   : > { %1283 = vst.msk [vmem:[%s3740_s18 + $0x60] sm:$0x1] %vm1270_vm14, %v1246_v43 }
 0x206   : > { %v2096_v10 = vadd.f32 %v2092_v47, %v3578_v46  ;;  %1284 = vst.msk [vmem:[%s3740_s18 + $0x68] sm:$0x1] %vm1270_vm14, %v1247_v2 }
 0x207   : > { %v2254_v13 = vpop.f32.mrf.mxu2  ;;  %1285 = vst.msk [vmem:[%s3740_s18 + $0x70] sm:$0x1] %vm1270_vm14, %v1248_v6  ;;  %v1229_v12 = vpop.f32.mrf.mxu3 }
 0x208   : > { %vm2100_vm0 = vcmp.gt.f32.partialorder %v2096_v10, 0.0  ;;  %v2104_v50 = vmul.f32 %v2096_v10, %v3552_v29  ;;  %1286 = vst.msk [vmem:[%s3740_s18 + $0x78] sm:$0x1] %vm1270_vm14, %v1249_v32  ;;  %v1250_v27 = vrot.slane %v1229_v12, 1  ;;  %v1251_v15 = vrot.slane %v1229_v12, 2  ;;  %v2412_v6 = vpop.f32.mrf.mxu1 }
 0x209   : > { %v2208_v61 = vpop.f32.mrf.mxu0  ;;  %v1252_v16 = vrot.slane %v1229_v12, 3  ;;  %1287 = vst.msk [vmem:[%s3740_s18 + $0x80] sm:$0x1] %vm1270_vm14, %v1229_v12 }
 0x20a   : > { %v2108_v19 = vsel %vm2100_vm0, %v2096_v10, %v2104_v50  ;;  %1288 = vst.msk [vmem:[%s3740_s18 + $0x88] sm:$0x1] %vm1270_vm14, %v1250_v27  ;;  %v2231_v44 = vadd.f32 %v3744_v37, %v2208_v61 }
 0x20b   : > { %v2110_v35 = vpack.c.bf16 %v2108_v19, %v2107_v18  ;;  %1289 = vst.msk [vmem:[%s3740_s18 + $0x90] sm:$0x1] %vm1270_vm14, %v1251_v15 }
 0x20c   : > { %1290 = vst.msk [vmem:[%s3740_s18 + $0x98] sm:$0x1] %vm1270_vm14, %v1252_v16  ;;  %v2264_v37 = vadd.f32 %v2254_v13, %v2231_v44 }
 0x20d   : > { %2117 = vmatpush.bf16.msrb.mxu3 %v2110_v35 }
 0x20e   : > { %v2268_v0 = vadd.f32 %v2264_v37, %v3604_v1 }
 0x20f   : > { %v2256_v23 = vpop.f32.mrf.mxu2  ;;  %v1231_v3 = vpop.f32.mrf.mxu3 }
 0x210   : > { %v2276_v17 = vmul.f32 %v2268_v0, %v3606_v4  ;;  %vm2272_vm9 = vcmp.gt.f32.partialorder %v2268_v0, 0.0  ;;  %v2414_v22 = vpop.f32.mrf.mxu1 }
 0x211   : > { %2118 = vmatpush.bf16.msrb.mxu3 %v2109_v24  ;;  %v2210_v52 = vpop.f32.mrf.mxu0 }
 0x212   : > { %v2233_v40 = vadd.f32 %v2232_v7, %v2210_v52 }
 0x214   : > { %3022 = vmatmul.msk.bf16.vlgmr.msrb.gmra.mxu3 %vm1208_vm12, %v3635_v41  ;;  %v2265_v49 = vadd.f32 %v2256_v23, %v2233_v40 }
 0x216   : > { %v2269_v5 = vadd.f32 %v2265_v49, %v3598_v57 }
 0x217   : > { %v2259_v25 = vpop.f32.mrf.mxu2  ;;  %v1407_v21 = vpop.f32.mrf.mxu3 }
 0x218   : > { %v1419_v33 = vrot.slane %v1407_v21, 1  ;;  %v1420_v30 = vrot.slane %v1407_v21, 2  ;;  %v1421_v55 = vrot.slane %v1407_v21, 3  ;;  %1453 = vst.msk [vmem:[%s3740_s18 + $0x1] sm:$0x1] %vm1270_vm14, %v1407_v21  ;;  %v1422_v36 = vrot.slane %v1407_v21, 4 }
 0x219   : > { %v2213_v45 = vpop.f32.mrf.mxu0  ;;  %v1423_v39 = vrot.slane %v1407_v21, 5  ;;  %v1424_v28 = vrot.slane %v1407_v21, 6  ;;  %v1425_v42 = vrot.slane %v1407_v21, 7  ;;  %v2277_v60 = vmul.f32 %v2269_v5, %v3619_v14 }
 0x21a   : > { %v2236_v38 = vadd.f32 %v2235_v9, %v2213_v45  ;;  %1454 = vst.msk [vmem:[%s3740_s18 + $0x9] sm:$0x1] %vm1270_vm14, %v1419_v33  ;;  %vm2273_vm8 = vcmp.gt.f32.partialorder %v2269_v5, 0.0  ;;  %v2280_v9 = vsel %vm2272_vm9, %v2268_v0, %v2276_v17 }
 0x21b   : > { %1455 = vst.msk [vmem:[%s3740_s18 + $0x11] sm:$0x1] %vm1270_vm14, %v1420_v30  ;;  %v2281_v20 = vsel %vm2273_vm8, %v2269_v5, %v2277_v60 }
 0x21c   : > { %1456 = vst.msk [vmem:[%s3740_s18 + $0x19] sm:$0x1] %vm1270_vm14, %v1421_v55  ;;  %v2266_v48 = vadd.f32 %v2259_v25, %v2236_v38  ;;  %v2284_v24 = vpack.c.bf16 %v2281_v20, %v2280_v9  ;;  %v2417_v25 = vpop.f32.mrf.mxu1 }
 0x21d   : > { %1457 = vst.msk [vmem:[%s3740_s18 + $0x21] sm:$0x1] %vm1270_vm14, %v1422_v36 }
 0x21e   : > { %1458 = vst.msk [vmem:[%s3740_s18 + $0x29] sm:$0x1] %vm1270_vm14, %v1423_v39  ;;  %v2270_v11 = vadd.f32 %v2266_v48, %v3592_v56 }
 0x21f   : > { %v2261_v53 = vpop.f32.mrf.mxu2  ;;  %1459 = vst.msk [vmem:[%s3740_s18 + $0x31] sm:$0x1] %vm1270_vm14, %v1424_v28  ;;  %v1409_v58 = vpop.f32.mrf.mxu3 }
 0x220   : > { %1460 = vst.msk [vmem:[%s3740_s18 + $0x39] sm:$0x1] %vm1270_vm14, %v1425_v42  ;;  %v1426_v59 = vrot.slane %v1409_v58, 1  ;;  %v1427_v62 = vrot.slane %v1409_v58, 2  ;;  %v1428_v43 = vrot.slane %v1409_v58, 3  ;;  %v1429_v26 = vrot.slane %v1409_v58, 4 }
 0x221   : > { %v2215_v63 = vpop.f32.mrf.mxu0  ;;  %1461 = vst.msk [vmem:[%s3740_s18 + $0x41] sm:$0x1] %vm1270_vm14, %v1409_v58  ;;  %v1430_v2 = vrot.slane %v1409_v58, 5  ;;  %v1431_v47 = vrot.slane %v1409_v58, 6  ;;  %v1432_v32 = vrot.slane %v1409_v58, 7  ;;  %v2278_v54 = vmul.f32 %v2270_v11, %v3588_v51 }
 0x222   : > { %v2238_v31 = vadd.f32 %v2237_v34, %v2215_v63  ;;  %1462 = vst.msk [vmem:[%s3740_s18 + $0x49] sm:$0x1] %vm1270_vm14, %v1426_v59  ;;  %vm2274_vm6 = vcmp.gt.f32.partialorder %v2270_v11, 0.0 }
 0x223   : > { %1463 = vst.msk [vmem:[%s3740_s18 + $0x51] sm:$0x1] %vm1270_vm14, %v1427_v62  ;;  %v2282_v18 = vsel %vm2274_vm6, %v2270_v11, %v2278_v54 }
 0x224   : > { %v2267_v7 = vadd.f32 %v2261_v53, %v2238_v31  ;;  %1464 = vst.msk [vmem:[%s3740_s18 + $0x59] sm:$0x1] %vm1270_vm14, %v1428_v43  ;;  %3023 = vmatmul.msk.bf16.gmra.mxu3 %vm1208_vm12, %v3658_v8  ;;  %v2419_v62 = vpop.f32.mrf.mxu1 }
 0x225   : > { %1465 = vst.msk [vmem:[%s3740_s18 + $0x61] sm:$0x1] %vm1270_vm14, %v1429_v26 }
 0x226   : > { %v2271_v10 = vadd.f32 %v2267_v7, %v3578_v46  ;;  %1466 = vst.msk [vmem:[%s3740_s18 + $0x69] sm:$0x1] %vm1270_vm14, %v1430_v2 }
 0x227   : > { %v2436_v13 = vpop.f32.mrf.mxu2  ;;  %1467 = vst.msk [vmem:[%s3740_s18 + $0x71] sm:$0x1] %vm1270_vm14, %v1431_v47  ;;  %v1412_v12 = vpop.f32.mrf.mxu3 }
 0x228   : > { %vm2275_vm7 = vcmp.gt.f32.partialorder %v2271_v10, 0.0  ;;  %v2279_v50 = vmul.f32 %v2271_v10, %v3552_v29  ;;  %1468 = vst.msk [vmem:[%s3740_s18 + $0x79] sm:$0x1] %vm1270_vm14, %v1432_v32  ;;  %v1433_v27 = vrot.slane %v1412_v12, 1  ;;  %v1434_v15 = vrot.slane %v1412_v12, 2 }
 0x229   : > { %v2390_v61 = vpop.f32.mrf.mxu0  ;;  %v1435_v16 = vrot.slane %v1412_v12, 3  ;;  %1469 = vst.msk [vmem:[%s3740_s18 + $0x81] sm:$0x1] %vm1270_vm14, %v1412_v12 }
 0x22a   : > { %v2283_v19 = vsel %vm2275_vm7, %v2271_v10, %v2279_v50  ;;  %1470 = vst.msk [vmem:[%s3740_s18 + $0x89] sm:$0x1] %vm1270_vm14, %v1433_v27  ;;  %v2413_v44 = vadd.f32 %v2412_v6, %v2390_v61 }
 0x22b   : > { %v2285_v35 = vpack.c.bf16 %v2283_v19, %v2282_v18  ;;  %1471 = vst.msk [vmem:[%s3740_s18 + $0x91] sm:$0x1] %vm1270_vm14, %v1434_v15 }
 0x22c   : > { %1472 = vst.msk [vmem:[%s3740_s18 + $0x99] sm:$0x1] %vm1270_vm14, %v1435_v16  ;;  %v2446_v37 = vadd.f32 %v2436_v13, %v2413_v44 }
 0x22d   : > { %2292 = vmatpush.bf16.msra.mxu3 %v2285_v35 }
 0x22f   : > { %v2438_v23 = vpop.f32.mrf.mxu2  ;;  %v1414_v3 = vpop.f32.mrf.mxu3 }
 0x231   : > { %2293 = vmatpush.bf16.msra.mxu3 %v2284_v24  ;;  %v2392_v52 = vpop.f32.mrf.mxu0 }
 0x232   : > { %v2415_v40 = vadd.f32 %v2414_v22, %v2392_v52 }
 0x234   : > { %3034 = vmatmul.msk.bf16.vlgmr.msra.gmra.mxu3 %vm1208_vm12, %v3635_v41  ;;  %v2447_v49 = vadd.f32 %v2438_v23, %v2415_v40 }
 0x236   : > { %v2451_v5 = vadd.f32 %v2447_v49, %v3598_v57 }
 0x237   : > { %v1582_v21 = vpop.f32.mrf.mxu3  ;;  %v2441_v45 = vpop.f32.mrf.mxu2 }
 0x238   : > { %v1594_v33 = vrot.slane %v1582_v21, 1  ;;  %v1595_v30 = vrot.slane %v1582_v21, 2  ;;  %v1596_v55 = vrot.slane %v1582_v21, 3  ;;  %1628 = vst.msk [vmem:[%s3740_s18 + $0x2] sm:$0x1] %vm1270_vm14, %v1582_v21  ;;  %v1597_v36 = vrot.slane %v1582_v21, 4 }
 0x239   : > { %v2395_v34 = vpop.f32.mrf.mxu0  ;;  %v1598_v39 = vrot.slane %v1582_v21, 5  ;;  %v1599_v28 = vrot.slane %v1582_v21, 6  ;;  %v1600_v42 = vrot.slane %v1582_v21, 7  ;;  %v2459_v54 = vmul.f32 %v2451_v5, %v3619_v14 }
 0x23a   : > { %v2418_v38 = vadd.f32 %v2417_v25, %v2395_v34  ;;  %1629 = vst.msk [vmem:[%s3740_s18 + $0xa] sm:$0x1] %vm1270_vm14, %v1594_v33  ;;  %vm2455_vm5 = vcmp.gt.f32.partialorder %v2451_v5, 0.0 }
 0x23b   : > { %1630 = vst.msk [vmem:[%s3740_s18 + $0x12] sm:$0x1] %vm1270_vm14, %v1595_v30 }
 0x23c   : > { %1631 = vst.msk [vmem:[%s3740_s18 + $0x1a] sm:$0x1] %vm1270_vm14, %v1596_v55  ;;  %v2448_v48 = vadd.f32 %v2441_v45, %v2418_v38 }
 0x23d   : > { %1632 = vst.msk [vmem:[%s3740_s18 + $0x22] sm:$0x1] %vm1270_vm14, %v1597_v36 }
 0x23e   : > { %1633 = vst.msk [vmem:[%s3740_s18 + $0x2a] sm:$0x1] %vm1270_vm14, %v1598_v39  ;;  %v2452_v11 = vadd.f32 %v2448_v48, %v3592_v56  ;;  %v2450_v56 = vadd.f32 %v2446_v37, %v3604_v1 }
 0x23f   : > { %1634 = vst.msk [vmem:[%s3740_s18 + $0x32] sm:$0x1] %vm1270_vm14, %v1599_v28  ;;  %v1584_v53 = vpop.f32.mrf.mxu3  ;;  %v2443_v6 = vpop.f32.mrf.mxu2 }
 0x240   : > { %1635 = vst.msk [vmem:[%s3740_s18 + $0x3a] sm:$0x1] %vm1270_vm14, %v1600_v42  ;;  %v1601_v58 = vrot.slane %v1584_v53, 1  ;;  %v1602_v59 = vrot.slane %v1584_v53, 2  ;;  %v1603_v43 = vrot.slane %v1584_v53, 3  ;;  %v1604_v26 = vrot.slane %v1584_v53, 4 }
 0x241   : > { %v2397_v63 = vpop.f32.mrf.mxu0  ;;  %1636 = vst.msk [vmem:[%s3740_s18 + $0x42] sm:$0x1] %vm1270_vm14, %v1584_v53  ;;  %v1605_v2 = vrot.slane %v1584_v53, 5  ;;  %v1606_v47 = vrot.slane %v1584_v53, 6  ;;  %v1607_v32 = vrot.slane %v1584_v53, 7  ;;  %v2460_v0 = vmul.f32 %v2452_v11, %v3588_v51 }
 0x242   : > { %v2420_v31 = vadd.f32 %v2419_v62, %v2397_v63  ;;  %1637 = vst.msk [vmem:[%s3740_s18 + $0x4a] sm:$0x1] %vm1270_vm14, %v1601_v58  ;;  %vm2456_vm4 = vcmp.gt.f32.partialorder %v2452_v11, 0.0  ;;  %v2458_v13 = vmul.f32 %v2450_v56, %v3606_v4  ;;  %vm2454_vm10 = vcmp.gt.f32.partialorder %v2450_v56, 0.0 }
 0x243   : > { %1638 = vst.msk [vmem:[%s3740_s18 + $0x52] sm:$0x1] %vm1270_vm14, %v1602_v59  ;;  %v2464_v14 = vsel %vm2456_vm4, %v2452_v11, %v2460_v0 }
 0x244   : > { %v2449_v7 = vadd.f32 %v2443_v6, %v2420_v31  ;;  %1639 = vst.msk [vmem:[%s3740_s18 + $0x5a] sm:$0x1] %vm1270_vm14, %v1603_v43  ;;  %3035 = vmatmul.msk.bf16.gmra.mxu3 %vm1208_vm12, %v3658_v8  ;;  %v2462_v27 = vsel %vm2454_vm10, %v2450_v56, %v2458_v13 }
 0x245   : > { %1640 = vst.msk [vmem:[%s3740_s18 + $0x62] sm:$0x1] %vm1270_vm14, %v1604_v26 }
 0x246   : > { %v2453_v57 = vadd.f32 %v2449_v7, %v3578_v46  ;;  %1641 = vst.msk [vmem:[%s3740_s18 + $0x6a] sm:$0x1] %vm1270_vm14, %v1605_v2 }
 0x247   : > { %1642 = vst.msk [vmem:[%s3740_s18 + $0x72] sm:$0x1] %vm1270_vm14, %v1606_v47  ;;  %v1587_v10 = vpop.f32.mrf.mxu3 }
 0x248   : > { %vm2457_vm2 = vcmp.gt.f32.partialorder %v2453_v57, 0.0  ;;  %v2461_v60 = vmul.f32 %v2453_v57, %v3552_v29  ;;  %1643 = vst.msk [vmem:[%s3740_s18 + $0x7a] sm:$0x1] %vm1270_vm14, %v1607_v32  ;;  %v1608_v1 = vrot.slane %v1587_v10, 1  ;;  %v1609_v51 = vrot.slane %v1587_v10, 2 }
 0x249   : > { %v1610_v46 = vrot.slane %v1587_v10, 3  ;;  %1644 = vst.msk [vmem:[%s3740_s18 + $0x82] sm:$0x1] %vm1270_vm14, %v1587_v10  ;;  %v2463_v29 = vsel %vm2455_vm5, %v2451_v5, %v2459_v54 }
 0x24a   : > { %v2465_v12 = vsel %vm2457_vm2, %v2453_v57, %v2461_v60  ;;  %1645 = vst.msk [vmem:[%s3740_s18 + $0x8a] sm:$0x1] %vm1270_vm14, %v1608_v1  ;;  %v2466_v15 = vpack.c.bf16 %v2463_v29, %v2462_v27 }
 0x24b   : > { %v2467_v50 = vpack.c.bf16 %v2465_v12, %v2464_v14  ;;  %1646 = vst.msk [vmem:[%s3740_s18 + $0x92] sm:$0x1] %vm1270_vm14, %v1609_v51 }
 0x24c   : > { %1647 = vst.msk [vmem:[%s3740_s18 + $0x9a] sm:$0x1] %vm1270_vm14, %v1610_v46 }
 0x24d   : > { %2474 = vmatpush.bf16.msrb.mxu3 %v2467_v50 }
 0x24f   : > { %v1589_v4 = vpop.f32.mrf.mxu3 }
 0x251   : > { %2475 = vmatpush.bf16.msrb.mxu3 %v2466_v15 }
 0x254   : > { %3046 = vmatmul.msk.bf16.vlgmr.msrb.gmra.mxu3 %vm1208_vm12, %v3635_v41 }
 0x257   : > { %v1763_v61 = vpop.f32.mrf.mxu3 }
 0x258   : > { %v1775_v16 = vrot.slane %v1763_v61, 1  ;;  %v1776_v17 = vrot.slane %v1763_v61, 2  ;;  %v1777_v18 = vrot.slane %v1763_v61, 3  ;;  %1809 = vst.msk [vmem:[%s3740_s18 + $0x3] sm:$0x1] %vm1270_vm14, %v1763_v61  ;;  %v1778_v19 = vrot.slane %v1763_v61, 4 }
 0x259   : > { %v1779_v35 = vrot.slane %v1763_v61, 5  ;;  %v1780_v20 = vrot.slane %v1763_v61, 6  ;;  %v1781_v22 = vrot.slane %v1763_v61, 7 }
 0x25a   : > { %1810 = vst.msk [vmem:[%s3740_s18 + $0xb] sm:$0x1] %vm1270_vm14, %v1775_v16 }
 0x25b   : > { %1811 = vst.msk [vmem:[%s3740_s18 + $0x13] sm:$0x1] %vm1270_vm14, %v1776_v17 }
 0x25c   : > { %1812 = vst.msk [vmem:[%s3740_s18 + $0x1b] sm:$0x1] %vm1270_vm14, %v1777_v18 }
 0x25d   : > { %1813 = vst.msk [vmem:[%s3740_s18 + $0x23] sm:$0x1] %vm1270_vm14, %v1778_v19 }
 0x25e   : > { %1814 = vst.msk [vmem:[%s3740_s18 + $0x2b] sm:$0x1] %vm1270_vm14, %v1779_v35 }
 0x25f   : > { %1815 = vst.msk [vmem:[%s3740_s18 + $0x33] sm:$0x1] %vm1270_vm14, %v1780_v20  ;;  %v1765_v41 = vpop.f32.mrf.mxu3 }
 0x260   : > { %1816 = vst.msk [vmem:[%s3740_s18 + $0x3b] sm:$0x1] %vm1270_vm14, %v1781_v22  ;;  %v1782_v9 = vrot.slane %v1765_v41, 1  ;;  %v1783_v23 = vrot.slane %v1765_v41, 2  ;;  %v1784_v24 = vrot.slane %v1765_v41, 3  ;;  %v1785_v3 = vrot.slane %v1765_v41, 4 }
 0x261   : > { %1817 = vst.msk [vmem:[%s3740_s18 + $0x43] sm:$0x1] %vm1270_vm14, %v1765_v41  ;;  %v1786_v52 = vrot.slane %v1765_v41, 5  ;;  %v1787_v25 = vrot.slane %v1765_v41, 6  ;;  %v1788_v21 = vrot.slane %v1765_v41, 7 }
 0x262   : > { %1818 = vst.msk [vmem:[%s3740_s18 + $0x4b] sm:$0x1] %vm1270_vm14, %v1782_v9 }
 0x263   : > { %1819 = vst.msk [vmem:[%s3740_s18 + $0x53] sm:$0x1] %vm1270_vm14, %v1783_v23 }
 0x264   : > { %1820 = vst.msk [vmem:[%s3740_s18 + $0x5b] sm:$0x1] %vm1270_vm14, %v1784_v24  ;;  %3047 = vmatmul.msk.bf16.gmra.mxu3 %vm1208_vm12, %v3658_v8 }
 0x265   : > { %1821 = vst.msk [vmem:[%s3740_s18 + $0x63] sm:$0x1] %vm1270_vm14, %v1785_v3 }
 0x266   : > { %1822 = vst.msk [vmem:[%s3740_s18 + $0x6b] sm:$0x1] %vm1270_vm14, %v1786_v52 }
 0x267   : > { %1823 = vst.msk [vmem:[%s3740_s18 + $0x73] sm:$0x1] %vm1270_vm14, %v1787_v25  ;;  %v1768_v33 = vpop.f32.mrf.mxu3 }
 0x268   : > { %1824 = vst.msk [vmem:[%s3740_s18 + $0x7b] sm:$0x1] %vm1270_vm14, %v1788_v21  ;;  %v1789_v30 = vrot.slane %v1768_v33, 1  ;;  %v1790_v55 = vrot.slane %v1768_v33, 2  ;;  %v1791_v45 = vrot.slane %v1768_v33, 3 }
 0x269   : > { %1825 = vst.msk [vmem:[%s3740_s18 + $0x83] sm:$0x1] %vm1270_vm14, %v1768_v33 }
 0x26a   : > { %1826 = vst.msk [vmem:[%s3740_s18 + $0x8b] sm:$0x1] %vm1270_vm14, %v1789_v30 }
 0x26b   : > { %1827 = vst.msk [vmem:[%s3740_s18 + $0x93] sm:$0x1] %vm1270_vm14, %v1790_v55 }
 0x26c   : > { %1828 = vst.msk [vmem:[%s3740_s18 + $0x9b] sm:$0x1] %vm1270_vm14, %v1791_v45 }
 0x26f   : > { %v1770_v8 = vpop.f32.mrf.mxu3 }
 0x277   : > { %v1938_v34 = vpop.f32.mrf.mxu3 }
 0x278   : > { %v1950_v36 = vrot.slane %v1938_v34, 1  ;;  %v1951_v38 = vrot.slane %v1938_v34, 2  ;;  %v1952_v39 = vrot.slane %v1938_v34, 3  ;;  %1984 = vst.msk [vmem:[%s3740_s18 + $0x4] sm:$0x1] %vm1270_vm14, %v1938_v34  ;;  %v1953_v40 = vrot.slane %v1938_v34, 4 }
 0x279   : > { %v1954_v28 = vrot.slane %v1938_v34, 5  ;;  %v1955_v42 = vrot.slane %v1938_v34, 6  ;;  %v1956_v44 = vrot.slane %v1938_v34, 7 }
 0x27a   : > { %1985 = vst.msk [vmem:[%s3740_s18 + $0xc] sm:$0x1] %vm1270_vm14, %v1950_v36 }
 0x27b   : > { %1986 = vst.msk [vmem:[%s3740_s18 + $0x14] sm:$0x1] %vm1270_vm14, %v1951_v38 }
 0x27c   : > { %1987 = vst.msk [vmem:[%s3740_s18 + $0x1c] sm:$0x1] %vm1270_vm14, %v1952_v39 }
 0x27d   : > { %1988 = vst.msk [vmem:[%s3740_s18 + $0x24] sm:$0x1] %vm1270_vm14, %v1953_v40 }
 0x27e   : > { %1989 = vst.msk [vmem:[%s3740_s18 + $0x2c] sm:$0x1] %vm1270_vm14, %v1954_v28 }
 0x27f   : > { %1990 = vst.msk [vmem:[%s3740_s18 + $0x34] sm:$0x1] %vm1270_vm14, %v1955_v42  ;;  %v1940_v48 = vpop.f32.mrf.mxu3 }
 0x280   : > { %1991 = vst.msk [vmem:[%s3740_s18 + $0x3c] sm:$0x1] %vm1270_vm14, %v1956_v44  ;;  %v1957_v49 = vrot.slane %v1940_v48, 1  ;;  %v1958_v53 = vrot.slane %v1940_v48, 2  ;;  %v1959_v58 = vrot.slane %v1940_v48, 3  ;;  %v1960_v59 = vrot.slane %v1940_v48, 4 }
 0x281   : > { %1992 = vst.msk [vmem:[%s3740_s18 + $0x44] sm:$0x1] %vm1270_vm14, %v1940_v48  ;;  %v1961_v62 = vrot.slane %v1940_v48, 5  ;;  %v1962_v63 = vrot.slane %v1940_v48, 6  ;;  %v1963_v43 = vrot.slane %v1940_v48, 7 }
 0x282   : > { %1993 = vst.msk [vmem:[%s3740_s18 + $0x4c] sm:$0x1] %vm1270_vm14, %v1957_v49 }
 0x283   : > { %1994 = vst.msk [vmem:[%s3740_s18 + $0x54] sm:$0x1] %vm1270_vm14, %v1958_v53 }
 0x284   : > { %1995 = vst.msk [vmem:[%s3740_s18 + $0x5c] sm:$0x1] %vm1270_vm14, %v1959_v58 }
 0x285   : > { %1996 = vst.msk [vmem:[%s3740_s18 + $0x64] sm:$0x1] %vm1270_vm14, %v1960_v59 }
 0x286   : > { %1997 = vst.msk [vmem:[%s3740_s18 + $0x6c] sm:$0x1] %vm1270_vm14, %v1961_v62 }
 0x287   : > { %1998 = vst.msk [vmem:[%s3740_s18 + $0x74] sm:$0x1] %vm1270_vm14, %v1962_v63  ;;  %v1943_v26 = vpop.f32.mrf.mxu3 }
 0x288   : > { %1999 = vst.msk [vmem:[%s3740_s18 + $0x7c] sm:$0x1] %vm1270_vm14, %v1963_v43  ;;  %v1964_v37 = vrot.slane %v1943_v26, 1  ;;  %v1965_v11 = vrot.slane %v1943_v26, 2  ;;  %v1966_v31 = vrot.slane %v1943_v26, 3 }
 0x289   : > { %2000 = vst.msk [vmem:[%s3740_s18 + $0x84] sm:$0x1] %vm1270_vm14, %v1943_v26 }
 0x28a   : > { %2001 = vst.msk [vmem:[%s3740_s18 + $0x8c] sm:$0x1] %vm1270_vm14, %v1964_v37 }
 0x28b   : > { %2002 = vst.msk [vmem:[%s3740_s18 + $0x94] sm:$0x1] %vm1270_vm14, %v1965_v11 }
 0x28c   : > { %2003 = vst.msk [vmem:[%s3740_s18 + $0x9c] sm:$0x1] %vm1270_vm14, %v1966_v31 }
 0x28f   : > { %v1945_v2 = vpop.f32.mrf.mxu3 }
 0x297   : > { %v2120_v5 = vpop.f32.mrf.mxu3 }
 0x298   : > { %v2132_v6 = vrot.slane %v2120_v5, 1  ;;  %v2133_v47 = vrot.slane %v2120_v5, 2  ;;  %v2134_v7 = vrot.slane %v2120_v5, 3  ;;  %2166 = vst.msk [vmem:[%s3740_s18 + $0x5] sm:$0x1] %vm1270_vm14, %v2120_v5  ;;  %v2135_v32 = vrot.slane %v2120_v5, 4 }
 0x299   : > { %v2136_v56 = vrot.slane %v2120_v5, 5  ;;  %v2137_v0 = vrot.slane %v2120_v5, 6  ;;  %v2138_v57 = vrot.slane %v2120_v5, 7 }
 0x29a   : > { %2167 = vst.msk [vmem:[%s3740_s18 + $0xd] sm:$0x1] %vm1270_vm14, %v2132_v6 }
 0x29b   : > { %2168 = vst.msk [vmem:[%s3740_s18 + $0x15] sm:$0x1] %vm1270_vm14, %v2133_v47 }
 0x29c   : > { %2169 = vst.msk [vmem:[%s3740_s18 + $0x1d] sm:$0x1] %vm1270_vm14, %v2134_v7 }
 0x29d   : > { %2170 = vst.msk [vmem:[%s3740_s18 + $0x25] sm:$0x1] %vm1270_vm14, %v2135_v32 }
 0x29e   : > { %2171 = vst.msk [vmem:[%s3740_s18 + $0x2d] sm:$0x1] %vm1270_vm14, %v2136_v56 }
 0x29f   : > { %2172 = vst.msk [vmem:[%s3740_s18 + $0x35] sm:$0x1] %vm1270_vm14, %v2137_v0  ;;  %v2122_v54 = vpop.f32.mrf.mxu3 }
 0x2a0   : > { %2173 = vst.msk [vmem:[%s3740_s18 + $0x3d] sm:$0x1] %vm1270_vm14, %v2138_v57  ;;  %v2139_v10 = vrot.slane %v2122_v54, 1  ;;  %v2140_v60 = vrot.slane %v2122_v54, 2  ;;  %v2141_v1 = vrot.slane %v2122_v54, 3  ;;  %v2142_v51 = vrot.slane %v2122_v54, 4 }
 0x2a1   : > { %2174 = vst.msk [vmem:[%s3740_s18 + $0x45] sm:$0x1] %vm1270_vm14, %v2122_v54  ;;  %v2143_v46 = vrot.slane %v2122_v54, 5  ;;  %v2144_v13 = vrot.slane %v2122_v54, 6  ;;  %v2145_v14 = vrot.slane %v2122_v54, 7 }
 0x2a2   : > { %2175 = vst.msk [vmem:[%s3740_s18 + $0x4d] sm:$0x1] %vm1270_vm14, %v2139_v10 }
 0x2a3   : > { %2176 = vst.msk [vmem:[%s3740_s18 + $0x55] sm:$0x1] %vm1270_vm14, %v2140_v60 }
 0x2a4   : > { %2177 = vst.msk [vmem:[%s3740_s18 + $0x5d] sm:$0x1] %vm1270_vm14, %v2141_v1 }
 0x2a5   : > { %2178 = vst.msk [vmem:[%s3740_s18 + $0x65] sm:$0x1] %vm1270_vm14, %v2142_v51 }
 0x2a6   : > { %2179 = vst.msk [vmem:[%s3740_s18 + $0x6d] sm:$0x1] %vm1270_vm14, %v2143_v46 }
 0x2a7   : > { %2180 = vst.msk [vmem:[%s3740_s18 + $0x75] sm:$0x1] %vm1270_vm14, %v2144_v13  ;;  %v2125_v12 = vpop.f32.mrf.mxu3 }
 0x2a8   : > { %2181 = vst.msk [vmem:[%s3740_s18 + $0x7d] sm:$0x1] %vm1270_vm14, %v2145_v14  ;;  %v2146_v50 = vrot.slane %v2125_v12, 1  ;;  %v2147_v29 = vrot.slane %v2125_v12, 2  ;;  %v2148_v27 = vrot.slane %v2125_v12, 3 }
 0x2a9   : > { %2182 = vst.msk [vmem:[%s3740_s18 + $0x85] sm:$0x1] %vm1270_vm14, %v2125_v12 }
 0x2aa   : > { %2183 = vst.msk [vmem:[%s3740_s18 + $0x8d] sm:$0x1] %vm1270_vm14, %v2146_v50 }
 0x2ab   : > { %2184 = vst.msk [vmem:[%s3740_s18 + $0x95] sm:$0x1] %vm1270_vm14, %v2147_v29 }
 0x2ac   : > { %2185 = vst.msk [vmem:[%s3740_s18 + $0x9d] sm:$0x1] %vm1270_vm14, %v2148_v27 }
 0x2af   : > { %v2127_v15 = vpop.f32.mrf.mxu3 }
 0x2b7   : > { %v2295_v4 = vpop.f32.mrf.mxu3 }
 0x2b8   : > { %v2307_v61 = vrot.slane %v2295_v4, 1  ;;  %v2308_v16 = vrot.slane %v2295_v4, 2  ;;  %v2309_v17 = vrot.slane %v2295_v4, 3  ;;  %2341 = vst.msk [vmem:[%s3740_s18 + $0x6] sm:$0x1] %vm1270_vm14, %v2295_v4  ;;  %v2310_v18 = vrot.slane %v2295_v4, 4 }
 0x2b9   : > { %v2311_v19 = vrot.slane %v2295_v4, 5  ;;  %v2312_v35 = vrot.slane %v2295_v4, 6  ;;  %v2313_v20 = vrot.slane %v2295_v4, 7 }
 0x2ba   : > { %2342 = vst.msk [vmem:[%s3740_s18 + $0xe] sm:$0x1] %vm1270_vm14, %v2307_v61 }
 0x2bb   : > { %2343 = vst.msk [vmem:[%s3740_s18 + $0x16] sm:$0x1] %vm1270_vm14, %v2308_v16 }
 0x2bc   : > { %2344 = vst.msk [vmem:[%s3740_s18 + $0x1e] sm:$0x1] %vm1270_vm14, %v2309_v17 }
 0x2bd   : > { %2345 = vst.msk [vmem:[%s3740_s18 + $0x26] sm:$0x1] %vm1270_vm14, %v2310_v18 }
 0x2be   : > { %2346 = vst.msk [vmem:[%s3740_s18 + $0x2e] sm:$0x1] %vm1270_vm14, %v2311_v19 }
 0x2bf   : > { %2347 = vst.msk [vmem:[%s3740_s18 + $0x36] sm:$0x1] %vm1270_vm14, %v2312_v35  ;;  %v2297_v22 = vpop.f32.mrf.mxu3 }
 0x2c0   : > { %2348 = vst.msk [vmem:[%s3740_s18 + $0x3e] sm:$0x1] %vm1270_vm14, %v2313_v20  ;;  %v2314_v41 = vrot.slane %v2297_v22, 1  ;;  %v2315_v9 = vrot.slane %v2297_v22, 2  ;;  %v2316_v23 = vrot.slane %v2297_v22, 3  ;;  %v2317_v24 = vrot.slane %v2297_v22, 4 }
 0x2c1   : > { %2349 = vst.msk [vmem:[%s3740_s18 + $0x46] sm:$0x1] %vm1270_vm14, %v2297_v22  ;;  %v2318_v3 = vrot.slane %v2297_v22, 5  ;;  %v2319_v52 = vrot.slane %v2297_v22, 6  ;;  %v2320_v25 = vrot.slane %v2297_v22, 7 }
 0x2c2   : > { %2350 = vst.msk [vmem:[%s3740_s18 + $0x4e] sm:$0x1] %vm1270_vm14, %v2314_v41 }
 0x2c3   : > { %2351 = vst.msk [vmem:[%s3740_s18 + $0x56] sm:$0x1] %vm1270_vm14, %v2315_v9 }
 0x2c4   : > { %2352 = vst.msk [vmem:[%s3740_s18 + $0x5e] sm:$0x1] %vm1270_vm14, %v2316_v23 }
 0x2c5   : > { %2353 = vst.msk [vmem:[%s3740_s18 + $0x66] sm:$0x1] %vm1270_vm14, %v2317_v24 }
 0x2c6   : > { %2354 = vst.msk [vmem:[%s3740_s18 + $0x6e] sm:$0x1] %vm1270_vm14, %v2318_v3 }
 0x2c7   : > { %2355 = vst.msk [vmem:[%s3740_s18 + $0x76] sm:$0x1] %vm1270_vm14, %v2319_v52  ;;  %v2300_v21 = vpop.f32.mrf.mxu3 }
 0x2c8   : > { %2356 = vst.msk [vmem:[%s3740_s18 + $0x7e] sm:$0x1] %vm1270_vm14, %v2320_v25  ;;  %v2321_v33 = vrot.slane %v2300_v21, 1  ;;  %v2322_v30 = vrot.slane %v2300_v21, 2  ;;  %v2323_v55 = vrot.slane %v2300_v21, 3 }
 0x2c9   : > { %2357 = vst.msk [vmem:[%s3740_s18 + $0x86] sm:$0x1] %vm1270_vm14, %v2300_v21 }
 0x2ca   : > { %2358 = vst.msk [vmem:[%s3740_s18 + $0x8e] sm:$0x1] %vm1270_vm14, %v2321_v33 }
 0x2cb   : > { %2359 = vst.msk [vmem:[%s3740_s18 + $0x96] sm:$0x1] %vm1270_vm14, %v2322_v30 }
 0x2cc   : > { %2360 = vst.msk [vmem:[%s3740_s18 + $0x9e] sm:$0x1] %vm1270_vm14, %v2323_v55 }
 0x2cf   : > { %v2302_v45 = vpop.f32.mrf.mxu3 }
 0x2d7   : > { %v2477_v8 = vpop.f32.mrf.mxu3 }
 0x2d8   : > { %v2489_v34 = vrot.slane %v2477_v8, 1  ;;  %v2490_v36 = vrot.slane %v2477_v8, 2  ;;  %v2491_v38 = vrot.slane %v2477_v8, 3  ;;  %2523 = vst.msk [vmem:[%s3740_s18 + $0x7] sm:$0x1] %vm1270_vm14, %v2477_v8  ;;  %v2492_v39 = vrot.slane %v2477_v8, 4 }
 0x2d9   : > { %v2493_v40 = vrot.slane %v2477_v8, 5  ;;  %v2494_v28 = vrot.slane %v2477_v8, 6  ;;  %v2495_v42 = vrot.slane %v2477_v8, 7 }
 0x2da   : > { %2524 = vst.msk [vmem:[%s3740_s18 + $0xf] sm:$0x1] %vm1270_vm14, %v2489_v34 }
 0x2db   : > { %2525 = vst.msk [vmem:[%s3740_s18 + $0x17] sm:$0x1] %vm1270_vm14, %v2490_v36 }
 0x2dc   : > { %2526 = vst.msk [vmem:[%s3740_s18 + $0x1f] sm:$0x1] %vm1270_vm14, %v2491_v38 }
 0x2dd   : > { %2527 = vst.msk [vmem:[%s3740_s18 + $0x27] sm:$0x1] %vm1270_vm14, %v2492_v39 }
 0x2de   : > { %2528 = vst.msk [vmem:[%s3740_s18 + $0x2f] sm:$0x1] %vm1270_vm14, %v2493_v40 }
 0x2df   : > { %2529 = vst.msk [vmem:[%s3740_s18 + $0x37] sm:$0x1] %vm1270_vm14, %v2494_v28  ;;  %v2479_v44 = vpop.f32.mrf.mxu3  ;;  %v2620_v2 = vld [vmem:[%s3740_s18] sm:$0xff] (%p3313_p5) }
 0x2e0   : > { %2530 = vst.msk [vmem:[%s3740_s18 + $0x3f] sm:$0x1] %vm1270_vm14, %v2495_v42  ;;  %v2496_v48 = vrot.slane %v2479_v44, 1  ;;  %v2497_v49 = vrot.slane %v2479_v44, 2  ;;  %v2498_v53 = vrot.slane %v2479_v44, 3  ;;  %v2499_v58 = vrot.slane %v2479_v44, 4 }
 0x2e1   : > { %2531 = vst.msk [vmem:[%s3740_s18 + $0x47] sm:$0x1] %vm1270_vm14, %v2479_v44  ;;  %v2500_v59 = vrot.slane %v2479_v44, 5  ;;  %v2501_v62 = vrot.slane %v2479_v44, 6  ;;  %v2502_v63 = vrot.slane %v2479_v44, 7  ;;  %v2622_v5 = vld [vmem:[%s3740_s18 + $0x8] sm:$0xff] (%p3313_p5) }
 0x2e2   : > { %2532 = vst.msk [vmem:[%s3740_s18 + $0x4f] sm:$0x1] %vm1270_vm14, %v2496_v48  ;;  %v2624_v6 = vld [vmem:[%s3740_s18 + $0x10] sm:$0xff] (%p3313_p5) }
 0x2e3   : > { %2533 = vst.msk [vmem:[%s3740_s18 + $0x57] sm:$0x1] %vm1270_vm14, %v2497_v49  ;;  %v2626_v47 = vld [vmem:[%s3740_s18 + $0x18] sm:$0xff] (%p3313_p5) }
 0x2e4   : > { %2534 = vst.msk [vmem:[%s3740_s18 + $0x5f] sm:$0x1] %vm1270_vm14, %v2498_v53  ;;  %v2628_v7 = vld [vmem:[%s3740_s18 + $0x20] sm:$0xff] (%p3313_p5) }
 0x2e5   : > { %2535 = vst.msk [vmem:[%s3740_s18 + $0x67] sm:$0x1] %vm1270_vm14, %v2499_v58  ;;  %v2630_v32 = vld [vmem:[%s3740_s18 + $0x28] sm:$0xff] (%p3313_p5) }
 0x2e6   : > { %2536 = vst.msk [vmem:[%s3740_s18 + $0x6f] sm:$0x1] %vm1270_vm14, %v2500_v59  ;;  %v2632_v56 = vld [vmem:[%s3740_s18 + $0x30] sm:$0xff] (%p3313_p5) }
 0x2e7   : > { %2537 = vst.msk [vmem:[%s3740_s18 + $0x77] sm:$0x1] %vm1270_vm14, %v2501_v62  ;;  %v2482_v43 = vpop.f32.mrf.mxu3  ;;  %v2634_v0 = vld [vmem:[%s3740_s18 + $0x38] sm:$0xff] (%p3313_p5) }
 0x2e8   : > { %2538 = vst.msk [vmem:[%s3740_s18 + $0x7f] sm:$0x1] %vm1270_vm14, %v2502_v63  ;;  %v2503_v26 = vrot.slane %v2482_v43, 1  ;;  %v2504_v37 = vrot.slane %v2482_v43, 2  ;;  %v2505_v11 = vrot.slane %v2482_v43, 3  ;;  %v2636_v57 = vld [vmem:[%s3740_s18 + $0x40] sm:$0xff] (%p3313_p5) }
 0x2e9   : > { %2539 = vst.msk [vmem:[%s3740_s18 + $0x87] sm:$0x1] %vm1270_vm14, %v2482_v43  ;;  %v2638_v54 = vld [vmem:[%s3740_s18 + $0x48] sm:$0xff] (%p3313_p5) }
 0x2ea   : > { %2540 = vst.msk [vmem:[%s3740_s18 + $0x8f] sm:$0x1] %vm1270_vm14, %v2503_v26  ;;  %v2640_v10 = vld [vmem:[%s3740_s18 + $0x50] sm:$0xff] (%p3313_p5) }
 0x2eb   : > { %2541 = vst.msk [vmem:[%s3740_s18 + $0x97] sm:$0x1] %vm1270_vm14, %v2504_v37  ;;  %2549 = sbr.rel (!%p3313_p5) target bundleno = 769 (0x301), region = 76  ;;  %v2642_v60 = vld [vmem:[%s3740_s18 + $0x58] sm:$0xff] (%p3313_p5) }
 0x2ec   : > { %2542 = vst.msk [vmem:[%s3740_s18 + $0x9f] sm:$0x1] %vm1270_vm14, %v2505_v11  ;;  %v2644_v1 = vld [vmem:[%s3740_s18 + $0x60] sm:$0xff] (%p3313_p5) }
 0x2ed   : > { %2621 = vst [vmem:[%s4113_s17] sm:$0xff] (%p3313_p5), %v2620_v2  ;;  %v2646_v51 = vld [vmem:[%s3740_s18 + $0x68] sm:$0xff] (%p3313_p5) }
 0x2ee   : > { %2623 = vst [vmem:[%s4113_s17 + $0x10] sm:$0xff] (%p3313_p5), %v2622_v5  ;;  %v2648_v46 = vld [vmem:[%s3740_s18 + $0x70] sm:$0xff] (%p3313_p5) }
 0x2ef   : > { %v2484_v31 = vpop.f32.mrf.mxu3  ;;  %2625 = vst [vmem:[%s4113_s17 + $0x20] sm:$0xff] (%p3313_p5), %v2624_v6  ;;  %v2650_v13 = vld [vmem:[%s3740_s18 + $0x78] sm:$0xff] (%p3313_p5) }
 0x2f0   : > { %2627 = vst [vmem:[%s4113_s17 + $0x30] sm:$0xff] %v2626_v47  ;;  %v2652_v14 = vld [vmem:[%s3740_s18 + $0x80] sm:$0xff] }
 0x2f1   : > { %2629 = vst [vmem:[%s4113_s17 + $0x40] sm:$0xff] %v2628_v7  ;;  %v2654_v12 = vld [vmem:[%s3740_s18 + $0x88] sm:$0xff] }
 0x2f2   : > { %2631 = vst [vmem:[%s4113_s17 + $0x50] sm:$0xff] %v2630_v32  ;;  %v2656_v50 = vld [vmem:[%s3740_s18 + $0x90] sm:$0xff] }
 0x2f3   : > { %2633 = vst [vmem:[%s4113_s17 + $0x60] sm:$0xff] %v2632_v56  ;;  %v2658_v29 = vld [vmem:[%s3740_s18 + $0x98] sm:$0xff] }
 0x2f4   : > { %2635 = vst [vmem:[%s4113_s17 + $0x70] sm:$0xff] %v2634_v0 }
 0x2f5   : > { %2637 = vst [vmem:[%s4113_s17 + $0x80] sm:$0xff] %v2636_v57 }
 0x2f6   : > { %2639 = vst [vmem:[%s4113_s17 + $0x90] sm:$0xff] %v2638_v54 }
 0x2f7   : > { %2641 = vst [vmem:[%s4113_s17 + $0xa0] sm:$0xff] %v2640_v10 }
 0x2f8   : > { %2643 = vst [vmem:[%s4113_s17 + $0xb0] sm:$0xff] %v2642_v60 }
 0x2f9   : > { %2645 = vst [vmem:[%s4113_s17 + $0xc0] sm:$0xff] %v2644_v1 }
 0x2fa   : > { %2647 = vst [vmem:[%s4113_s17 + $0xd0] sm:$0xff] %v2646_v51 }
 0x2fb   : > { %2649 = vst [vmem:[%s4113_s17 + $0xe0] sm:$0xff] %v2648_v46 }
 0x2fc   : > { %2651 = vst [vmem:[%s4113_s17 + $0xf0] sm:$0xff] %v2650_v13 }
 0x2fd   : > { %2653 = vst [vmem:[%s4113_s17 + $0x100] sm:$0xff] %v2652_v14 }
 0x2fe   : > { %2655 = vst [vmem:[%s4113_s17 + $0x110] sm:$0xff] %v2654_v12 }
 0x2ff   : > { %2657 = vst [vmem:[%s4113_s17 + $0x120] sm:$0xff] %v2656_v50 }
 0x300   : > { %2659 = vst [vmem:[%s4113_s17 + $0x130] sm:$0xff] %v2658_v29 }
 0x301 PF: > { %s4214_s13 = sld [smem:[#allocation9_spill]] }
 0x302   : > { %s4215_s25 = sld [smem:[#allocation4_spill]] }
 0x303   : > { %s4216_s26 = sld [smem:[#allocation12_spill]] }
 0x304   : > { %s4217_s27 = sld [smem:[#allocation7_spill]] }
 0x305   : > { %s4218_s28 = sld [smem:[#allocation8_spill]] }
 0x306   : > { %s4219_s29 = sld [smem:[#allocation10_spill]] }
 0x307   : > { %s23_s14 = sadd.s32 1, %s4214_s13   ;;  %s4220_s30 = sld [smem:[#allocation11_spill]] }
 0x308   : > { %p20_p5 = scmp.ge.s32.totalorder %s23_s14, 6  }
 0x30a   :  { %22 = sbr.rel (!%p20_p5) target bundleno = 6 (0x6), region = 168 }

</bundles_post_ra>
